<compile_context>
chip_gen: v6e
topology: v6e:2x2x1
jax: 0.10.0
libtpu: 0.0.40
codegen_flags: <defaults>
</compile_context>

<pallas_src>
import functools

import jax
import jax.numpy as jnp
from jax.experimental import pallas as pl
from jax.experimental.pallas import tpu as pltpu


# ----------------------------------------------------------------------------
# Fused Pallas kernel: single invocation, static in-kernel layer loop
# ----------------------------------------------------------------------------
def _fused_gcn_jk_kernel(a_ref, x_ref, w_ref, b_ref, pool_ref, fc1w_ref,
                         fc1b_ref, fc2w_ref, fc2b_ref, o_ref, *,
                         num_layers, num_classes):
    a = a_ref[...]                       # (n_pad, n_pad)  bf16, VMEM-resident
    pool = pool_ref[...]                 # (g_pad, n_pad)  bf16
    h = x_ref[...]                       # (n_pad, h_pad)  bf16 (padded X0)
    acc1 = jnp.zeros((pool.shape[0], h.shape[1]), jnp.float32)  # fc1 accum

    for l in range(num_layers):          # static loop -> fully unrolled
        # partitioned conv == block-diagonal weight; conv bias + eval-BN
        # already folded into (w', b').  bf16 MXU matmuls, f32 accumulation.
        xw = jnp.dot(h, w_ref[l], preferred_element_type=jnp.float32)
        agg = jnp.dot(a, xw.astype(jnp.bfloat16),
                      preferred_element_type=jnp.float32)
        y = jnp.maximum(agg + b_ref[l], 0.0)          # f32 bias + ReLU
        h = y.astype(jnp.bfloat16)                    # next-layer input (bf16)

        # fused JumpingKnowledge('cat') + global_mean_pool + fc1:
        #   fc1(cat_l pool @ y_l) = sum_l (pool @ y_l) @ fc1_w[l]
        pooled = jnp.dot(pool, h, preferred_element_type=jnp.float32)
        acc1 = acc1 + jnp.dot(pooled.astype(jnp.bfloat16), fc1w_ref[l],
                              preferred_element_type=jnp.float32)

    # --- head: fc1 bias + ReLU + fc2 + masked log_softmax (all f32 logits) --
    hfc = jnp.maximum(acc1 + fc1b_ref[...], 0.0)
    logits = jnp.dot(hfc.astype(jnp.bfloat16), fc2w_ref[...],
                     preferred_element_type=jnp.float32) + fc2b_ref[...]
    col = jax.lax.broadcasted_iota(jnp.int32, logits.shape, 1)
    logits = jnp.where(col < num_classes, logits, -1e30)   # f32-safe mask
    m = jnp.max(logits, axis=-1, keepdims=True)
    z = logits - m
    lse = jnp.log(jnp.sum(jnp.exp(z), axis=-1, keepdims=True))
    o_ref[...] = z - lse


def fused_forward(a_pad, x_pad, w_stack, b_stack, pool_pad, fc1w_stack,
                  fc1_b, fc2_w, fc2_b, *, num_layers, num_classes):
    n_pad, h_pad = x_pad.shape
    g_pad = pool_pad.shape[0]
    c_pad = fc2_w.shape[1]

    flops = num_layers * (2 * n_pad * h_pad * h_pad        # H @ W'
                          + 2 * n_pad * n_pad * h_pad      # A_hat @ (H W')
                          + 2 * g_pad * n_pad * h_pad      # pool @ y
                          + 2 * g_pad * h_pad * h_pad)     # pooled @ fc1_w[l]
    flops += 2 * g_pad * h_pad * c_pad                     # fc2
    bytes_accessed = (a_pad.size * 2 + x_pad.size * 2 + w_stack.size * 2
                      + b_stack.size * 4 + pool_pad.size * 2
                      + fc1w_stack.size * 2 + fc1_b.size * 4
                      + fc2_w.size * 2 + fc2_b.size * 4 + g_pad * c_pad * 4)

    kernel = functools.partial(_fused_gcn_jk_kernel,
                               num_layers=num_layers, num_classes=num_classes)
    vmem = pltpu.MemorySpace.VMEM
    return pl.pallas_call(
        kernel,
        out_shape=jax.ShapeDtypeStruct((g_pad, c_pad), jnp.float32),
        # No grid: each operand gets a single DMA into VMEM (single-buffered),
        # including the full weight stacks (only a few hundred KiB total).
        in_specs=[pl.BlockSpec(memory_space=vmem)] * 9,
        out_specs=pl.BlockSpec(memory_space=vmem),
        compiler_params=pltpu.CompilerParams(
            vmem_limit_bytes=32 * 1024 * 1024),
        cost_estimate=pl.CostEstimate(flops=int(flops),
                                      transcendentals=int(g_pad * c_pad),
                                      bytes_accessed=int(bytes_accessed)),
    )(a_pad, x_pad, w_stack, b_stack, pool_pad, fc1w_stack, fc1_b, fc2_w, fc2_b)


# ----------------------------------------------------------------------------
# Plain-JAX glue: padding, parameter setup (with BN/bias folding), operators
# ----------------------------------------------------------------------------
def _round_up(v, m):
    return (v + m - 1) // m * m


def _pad2d(a, shape):
    out = jnp.zeros(shape, a.dtype)
    return out.at[:a.shape[0], :a.shape[1]].set(a)


def block_diag(blocks):
    rows = sum(b.shape[0] for b in blocks)
    cols = sum(b.shape[1] for b in blocks)
    out = jnp.zeros((rows, cols), jnp.float32)
    r = c = 0
    for b in blocks:
        out = out.at[r:r + b.shape[0], c:c + b.shape[1]].set(b)
        r += b.shape[0]
        c += b.shape[1]
    return out


def build_graph_operators(edge_index, batch, num_nodes, num_graphs):
    """Dense A_hat = D^-1/2 (A + I_remaining) D^-1/2 and mean-pool operator.

    Hoisted out of the per-forward path: build once per graph topology.
    Duplicate (src, dst) pairs scatter-add (matches PyG gcn_norm with summed
    edge weights).
    """
    src, dst = edge_index[0], edge_index[1]
    a = jnp.zeros((num_nodes, num_nodes), jnp.float32).at[dst, src].add(1.0)
    diag = jnp.diagonal(a)                            # add_remaining_self_loops
    a = a + jnp.diag(jnp.where(diag == 0.0, 1.0, 0.0))
    deg = jnp.sum(a, axis=1)
    dinv = jnp.where(deg > 0, jax.lax.rsqrt(deg), 0.0)
    a_hat = a * dinv[:, None] * dinv[None, :]

    onehot = (batch[None, :] == jnp.arange(num_graphs)[:, None]).astype(jnp.float32)
    counts = jnp.maximum(jnp.sum(onehot, axis=1, keepdims=True), 1.0)
    pool = onehot / counts
    return a_hat, pool


def pad_graph_operators(a_hat, pool, n_pad, g_pad):
    # bf16 MXU operands (values in [0,1]); halves HBM/VMEM for the O(N^2) term.
    a_pad = _pad2d(a_hat, (n_pad, n_pad)).astype(jnp.bfloat16)
    pool_pad = _pad2d(pool, (g_pad, n_pad)).astype(jnp.bfloat16)
    return a_pad, pool_pad


def init_params(key, input_dim, hidden_dim, output_dim, num_layers, num_partitions):
    assert input_dim % num_partitions == 0
    assert hidden_dim % num_partitions == 0
    eps = 1e-5
    h_pad = _round_up(max(input_dim, hidden_dim), 128)   # lane-dense features
    c_pad = _round_up(output_dim, 128)                   # lane-dense logits

    raw_layers, w_list, b_list = [], [], []
    for layer in range(num_layers):
        in_dim = input_dim if layer == 0 else hidden_dim
        part_in = in_dim // num_partitions
        part_h = hidden_dim // num_partitions
        blocks, biases = [], []
        for _ in range(num_partitions):
            key, k1 = jax.random.split(key)
            blocks.append(0.1 * jax.random.normal(k1, (part_in, part_h), jnp.float32))
            biases.append(jnp.zeros((part_h,), jnp.float32))   # GCNConv bias init = 0
        w_bd = block_diag(blocks)          # chunk -> conv -> cat == block-diag weight
        b = jnp.concatenate(biases)
        # BatchNorm1d (eval): gamma=1, beta=0, running_mean=0, running_var=1
        gamma = jnp.ones((hidden_dim,), jnp.float32)
        beta = jnp.zeros((hidden_dim,), jnp.float32)
        run_mean = jnp.zeros((hidden_dim,), jnp.float32)
        run_var = jnp.ones((hidden_dim,), jnp.float32)
        scale = gamma / jnp.sqrt(run_var + eps)
        shift = beta - run_mean * scale
        raw_layers.append(dict(w=w_bd, b=b, scale=scale, shift=shift))
        # Fold conv bias + eval-BN into the weights
        w_folded = w_bd * scale[None, :]
        b_folded = b * scale + shift
        w_list.append(_pad2d(w_folded, (h_pad, h_pad)).astype(jnp.bfloat16))
        b_list.append(_pad2d(b_folded[None, :], (1, h_pad)))        # f32 bias

    key, k1, k2 = jax.random.split(key, 3)
    fc1_w = 0.1 * jax.random.normal(k1, (hidden_dim * num_layers, hidden_dim), jnp.float32)
    fc1_b = jnp.zeros((hidden_dim,), jnp.float32)
    fc2_w = 0.1 * jax.random.normal(k2, (hidden_dim, output_dim), jnp.float32)
    fc2_b = jnp.zeros((output_dim,), jnp.float32)

    fc1w_stack = jnp.stack([
        _pad2d(fc1_w[l * hidden_dim:(l + 1) * hidden_dim, :], (h_pad, h_pad))
        for l in range(num_layers)]).astype(jnp.bfloat16)

    return dict(
        w_stack=jnp.stack(w_list),                   # [L, h_pad, h_pad] bf16
        b_stack=jnp.stack(b_list),                   # [L, 1, h_pad]    f32
        fc1w_stack=fc1w_stack,                       # [L, h_pad, h_pad] bf16
        fc1_b=_pad2d(fc1_b[None, :], (1, h_pad)),                      # f32
        fc2_w=_pad2d(fc2_w, (h_pad, c_pad)).astype(jnp.bfloat16),      # bf16
        fc2_b=_pad2d(fc2_b[None, :], (1, c_pad)),                      # f32
        raw=dict(layers=raw_layers, fc1_w=fc1_w, fc1_b=fc1_b,
                 fc2_w=fc2_w, fc2_b=fc2_b),
        dims=dict(h_pad=h_pad, c_pad=c_pad, num_layers=num_layers,
                  output_dim=output_dim),
    )


def gcn_jk_eeg_forward(params, x, a_pad, pool_pad, num_graphs):
    dims = params["dims"]
    n_pad = a_pad.shape[0]
    x_pad = _pad2d(x, (n_pad, dims["h_pad"])).astype(jnp.bfloat16)
    out = fused_forward(a_pad, x_pad, params["w_stack"], params["b_stack"],
                        pool_pad, params["fc1w_stack"], params["fc1_b"],
                        params["fc2_w"], params["fc2_b"],
                        num_layers=dims["num_layers"],
                        num_classes=dims["output_dim"])
    return out[:num_graphs, :dims["output_dim"]]


# ----------------------------------------------------------------------------
# Pure-JAX reference (unfolded f32 math) for correctness checking
# ----------------------------------------------------------------------------
def reference_forward(raw, x, a_hat, pool):
    h = x
    outs = []
    for lp in raw["layers"]:
        h = a_hat @ (h @ lp["w"]) + lp["b"][None, :]
        h = h * lp["scale"][None, :] + lp["shift"][None, :]
        h = jnp.maximum(h, 0.0)
        outs.append(h)
    xc = jnp.concatenate(outs, axis=-1)
    p = pool @ xc
    h1 = jnp.maximum(p @ raw["fc1_w"] + raw["fc1_b"][None, :], 0.0)
    logits = h1 @ raw["fc2_w"] + raw["fc2_b"][None, :]
    return jax.nn.log_softmax(logits, axis=-1)


# ----------------------------------------------------------------------------
if __name__ == "__main__":
    input_dim, hidden_dim, output_dim = 16, 32, 4
    num_layers, num_partitions = 3, 2
    num_nodes, num_graphs = 16, 2

    key = jax.random.PRNGKey(0)
    key, kx = jax.random.split(key)
    x = jax.random.normal(kx, (num_nodes, input_dim), jnp.float32)

    # Simple symmetric ring graph over all nodes.
    src = jnp.arange(num_nodes, dtype=jnp.int32)
    dst = (src + 1) % num_nodes
    edge_index = jnp.stack([jnp.concatenate([src, dst]),
                            jnp.concatenate([dst, src])], axis=0)   # [2, 2N]

    # First half of the nodes belong to graph 0, second half to graph 1.
    batch = jnp.concatenate([jnp.zeros(num_nodes // 2, jnp.int32),
                             jnp.ones(num_nodes - num_nodes // 2, jnp.int32)])

    params = init_params(key, input_dim, hidden_dim, output_dim,
                         num_layers, num_partitions)

    # Hoisted per-topology preprocessing: build + pad the graph operators once.
    a_hat, pool = build_graph_operators(edge_index, batch, num_nodes, num_graphs)
    n_pad = _round_up(num_nodes, 128)    # lane-dense contraction dim (review #3)
    g_pad = _round_up(num_graphs, 8)     # sublane-aligned graph dim
    a_pad, pool_pad = pad_graph_operators(a_hat, pool, n_pad, g_pad)

    out = gcn_jk_eeg_forward(params, x, a_pad, pool_pad, num_graphs)
    out = jax.block_until_ready(out)

    ref = reference_forward(params["raw"], x, a_hat, pool)

    assert out.shape == (num_graphs, output_dim)
    # log_softmax rows should exponentiate-sum to 1
    assert jnp.allclose(jnp.sum(jnp.exp(out), axis=-1), 1.0, atol=1e-4)
    # match the unfolded f32 reference (bf16 operands -> loose tolerance)
    assert jnp.allclose(out, ref, atol=3e-2, rtol=3e-2)
    print("KERNEL_OK")
</pallas_src>

<mosaic_0001>
module attributes {stable_mosaic.version = 11 : i64} {
  func.func @_fused_gcn_jk_kernel(%arg0: memref<128x128xbf16, #tpu.memory_space<vmem>>, %arg1: memref<128x128xbf16, #tpu.memory_space<vmem>>, %arg2: memref<3x128x128xbf16, #tpu.memory_space<vmem>>, %arg3: memref<3x1x128xf32, #tpu.memory_space<vmem>>, %arg4: memref<8x128xbf16, #tpu.memory_space<vmem>>, %arg5: memref<3x128x128xbf16, #tpu.memory_space<vmem>>, %arg6: memref<1x128xf32, #tpu.memory_space<vmem>>, %arg7: memref<128x128xbf16, #tpu.memory_space<vmem>>, %arg8: memref<1x128xf32, #tpu.memory_space<vmem>>, %arg9: memref<8x128xf32, #tpu.memory_space<vmem>>) attributes {dimension_semantics = [], scalar_prefetch = 0 : i64, scratch_operands = 0 : i64, tpu.core_type = #tpu.core_type<tc>} {
    %c0 = arith.constant 0 : index
    %c0_0 = arith.constant 0 : index
    %0 = vector.load %arg0[%c0, %c0_0] : memref<128x128xbf16, #tpu.memory_space<vmem>>, vector<128x128xbf16>
    %c0_1 = arith.constant 0 : index
    %c0_2 = arith.constant 0 : index
    %1 = vector.load %arg4[%c0_1, %c0_2] : memref<8x128xbf16, #tpu.memory_space<vmem>>, vector<8x128xbf16>
    %c0_3 = arith.constant 0 : index
    %c0_4 = arith.constant 0 : index
    %2 = vector.load %arg1[%c0_3, %c0_4] : memref<128x128xbf16, #tpu.memory_space<vmem>>, vector<128x128xbf16>
    %cst = arith.constant 0.000000e+00 : f32
    %3 = vector.broadcast %cst : f32 to vector<8x128xf32>
    %c0_5 = arith.constant 0 : index
    %c0_6 = arith.constant 0 : index
    %c0_7 = arith.constant 0 : index
    %4 = vector.load %arg2[%c0_5, %c0_6, %c0_7] : memref<3x128x128xbf16, #tpu.memory_space<vmem>>, vector<1x128x128xbf16>
    %5 = vector.shape_cast %4 : vector<1x128x128xbf16> to vector<128x128xbf16>
    %cst_8 = arith.constant dense<0.000000e+00> : vector<128x128xf32>
    %6 = tpu.matmul %2, %5, %cst_8 {dimension_numbers = #tpu.dot_dimension_numbers<[1], [0], [0], [1], [0, 0, 1, 1], [], []>} : vector<128x128xbf16>, vector<128x128xbf16>, vector<128x128xf32> -> vector<128x128xf32>
    %7 = arith.truncf %6 : vector<128x128xf32> to vector<128x128xbf16>
    %cst_9 = arith.constant dense<0.000000e+00> : vector<128x128xf32>
    %8 = tpu.matmul %0, %7, %cst_9 {dimension_numbers = #tpu.dot_dimension_numbers<[1], [0], [0], [1], [0, 0, 1, 1], [], []>} : vector<128x128xbf16>, vector<128x128xbf16>, vector<128x128xf32> -> vector<128x128xf32>
    %c0_10 = arith.constant 0 : index
    %c0_11 = arith.constant 0 : index
    %c0_12 = arith.constant 0 : index
    %9 = vector.load %arg3[%c0_10, %c0_11, %c0_12] : memref<3x1x128xf32, #tpu.memory_space<vmem>>, vector<1x1x128xf32>
    %10 = vector.shape_cast %9 : vector<1x1x128xf32> to vector<1x128xf32>
    %11 = vector.broadcast %10 : vector<1x128xf32> to vector<128x128xf32>
    %12 = arith.addf %8, %11 : vector<128x128xf32>
    %cst_13 = arith.constant 0.000000e+00 : f32
    %13 = vector.broadcast %cst_13 : f32 to vector<128x128xf32>
    %14 = arith.maximumf %12, %13 : vector<128x128xf32>
    %15 = arith.truncf %14 : vector<128x128xf32> to vector<128x128xbf16>
    %cst_14 = arith.constant dense<0.000000e+00> : vector<8x128xf32>
    %16 = tpu.matmul %1, %15, %cst_14 {dimension_numbers = #tpu.dot_dimension_numbers<[1], [0], [0], [1], [0, 0, 1, 1], [], []>} : vector<8x128xbf16>, vector<128x128xbf16>, vector<8x128xf32> -> vector<8x128xf32>
    %17 = arith.truncf %16 : vector<8x128xf32> to vector<8x128xbf16>
    %c0_15 = arith.constant 0 : index
    %c0_16 = arith.constant 0 : index
    %c0_17 = arith.constant 0 : index
    %18 = vector.load %arg5[%c0_15, %c0_16, %c0_17] : memref<3x128x128xbf16, #tpu.memory_space<vmem>>, vector<1x128x128xbf16>
    %19 = vector.shape_cast %18 : vector<1x128x128xbf16> to vector<128x128xbf16>
    %cst_18 = arith.constant dense<0.000000e+00> : vector<8x128xf32>
    %20 = tpu.matmul %17, %19, %cst_18 {dimension_numbers = #tpu.dot_dimension_numbers<[1], [0], [0], [1], [0, 0, 1, 1], [], []>} : vector<8x128xbf16>, vector<128x128xbf16>, vector<8x128xf32> -> vector<8x128xf32>
    %21 = arith.addf %3, %20 : vector<8x128xf32>
    %c1 = arith.constant 1 : index
    %c0_19 = arith.constant 0 : index
    %c0_20 = arith.constant 0 : index
    %22 = vector.load %arg2[%c1, %c0_19, %c0_20] : memref<3x128x128xbf16, #tpu.memory_space<vmem>>, vector<1x128x128xbf16>
    %23 = vector.shape_cast %22 : vector<1x128x128xbf16> to vector<128x128xbf16>
    %cst_21 = arith.constant dense<0.000000e+00> : vector<128x128xf32>
    %24 = tpu.matmul %15, %23, %cst_21 {dimension_numbers = #tpu.dot_dimension_numbers<[1], [0], [0], [1], [0, 0, 1, 1], [], []>} : vector<128x128xbf16>, vector<128x128xbf16>, vector<128x128xf32> -> vector<128x128xf32>
    %25 = arith.truncf %24 : vector<128x128xf32> to vector<128x128xbf16>
    %cst_22 = arith.constant dense<0.000000e+00> : vector<128x128xf32>
    %26 = tpu.matmul %0, %25, %cst_22 {dimension_numbers = #tpu.dot_dimension_numbers<[1], [0], [0], [1], [0, 0, 1, 1], [], []>} : vector<128x128xbf16>, vector<128x128xbf16>, vector<128x128xf32> -> vector<128x128xf32>
    %c1_23 = arith.constant 1 : index
    %c0_24 = arith.constant 0 : index
    %c0_25 = arith.constant 0 : index
    %27 = vector.load %arg3[%c1_23, %c0_24, %c0_25] : memref<3x1x128xf32, #tpu.memory_space<vmem>>, vector<1x1x128xf32>
    %28 = vector.shape_cast %27 : vector<1x1x128xf32> to vector<1x128xf32>
    %29 = vector.broadcast %28 : vector<1x128xf32> to vector<128x128xf32>
    %30 = arith.addf %26, %29 : vector<128x128xf32>
    %cst_26 = arith.constant 0.000000e+00 : f32
    %31 = vector.broadcast %cst_26 : f32 to vector<128x128xf32>
    %32 = arith.maximumf %30, %31 : vector<128x128xf32>
    %33 = arith.truncf %32 : vector<128x128xf32> to vector<128x128xbf16>
    %cst_27 = arith.constant dense<0.000000e+00> : vector<8x128xf32>
    %34 = tpu.matmul %1, %33, %cst_27 {dimension_numbers = #tpu.dot_dimension_numbers<[1], [0], [0], [1], [0, 0, 1, 1], [], []>} : vector<8x128xbf16>, vector<128x128xbf16>, vector<8x128xf32> -> vector<8x128xf32>
    %35 = arith.truncf %34 : vector<8x128xf32> to vector<8x128xbf16>
    %c1_28 = arith.constant 1 : index
    %c0_29 = arith.constant 0 : index
    %c0_30 = arith.constant 0 : index
    %36 = vector.load %arg5[%c1_28, %c0_29, %c0_30] : memref<3x128x128xbf16, #tpu.memory_space<vmem>>, vector<1x128x128xbf16>
    %37 = vector.shape_cast %36 : vector<1x128x128xbf16> to vector<128x128xbf16>
    %cst_31 = arith.constant dense<0.000000e+00> : vector<8x128xf32>
    %38 = tpu.matmul %35, %37, %cst_31 {dimension_numbers = #tpu.dot_dimension_numbers<[1], [0], [0], [1], [0, 0, 1, 1], [], []>} : vector<8x128xbf16>, vector<128x128xbf16>, vector<8x128xf32> -> vector<8x128xf32>
    %39 = arith.addf %21, %38 : vector<8x128xf32>
    %c2 = arith.constant 2 : index
    %c0_32 = arith.constant 0 : index
    %c0_33 = arith.constant 0 : index
    %40 = vector.load %arg2[%c2, %c0_32, %c0_33] : memref<3x128x128xbf16, #tpu.memory_space<vmem>>, vector<1x128x128xbf16>
    %41 = vector.shape_cast %40 : vector<1x128x128xbf16> to vector<128x128xbf16>
    %cst_34 = arith.constant dense<0.000000e+00> : vector<128x128xf32>
    %42 = tpu.matmul %33, %41, %cst_34 {dimension_numbers = #tpu.dot_dimension_numbers<[1], [0], [0], [1], [0, 0, 1, 1], [], []>} : vector<128x128xbf16>, vector<128x128xbf16>, vector<128x128xf32> -> vector<128x128xf32>
    %43 = arith.truncf %42 : vector<128x128xf32> to vector<128x128xbf16>
    %cst_35 = arith.constant dense<0.000000e+00> : vector<128x128xf32>
    %44 = tpu.matmul %0, %43, %cst_35 {dimension_numbers = #tpu.dot_dimension_numbers<[1], [0], [0], [1], [0, 0, 1, 1], [], []>} : vector<128x128xbf16>, vector<128x128xbf16>, vector<128x128xf32> -> vector<128x128xf32>
    %c2_36 = arith.constant 2 : index
    %c0_37 = arith.constant 0 : index
    %c0_38 = arith.constant 0 : index
    %45 = vector.load %arg3[%c2_36, %c0_37, %c0_38] : memref<3x1x128xf32, #tpu.memory_space<vmem>>, vector<1x1x128xf32>
    %46 = vector.shape_cast %45 : vector<1x1x128xf32> to vector<1x128xf32>
    %47 = vector.broadcast %46 : vector<1x128xf32> to vector<128x128xf32>
    %48 = arith.addf %44, %47 : vector<128x128xf32>
    %cst_39 = arith.constant 0.000000e+00 : f32
    %49 = vector.broadcast %cst_39 : f32 to vector<128x128xf32>
    %50 = arith.maximumf %48, %49 : vector<128x128xf32>
    %51 = arith.truncf %50 : vector<128x128xf32> to vector<128x128xbf16>
    %cst_40 = arith.constant dense<0.000000e+00> : vector<8x128xf32>
    %52 = tpu.matmul %1, %51, %cst_40 {dimension_numbers = #tpu.dot_dimension_numbers<[1], [0], [0], [1], [0, 0, 1, 1], [], []>} : vector<8x128xbf16>, vector<128x128xbf16>, vector<8x128xf32> -> vector<8x128xf32>
    %53 = arith.truncf %52 : vector<8x128xf32> to vector<8x128xbf16>
    %c2_41 = arith.constant 2 : index
    %c0_42 = arith.constant 0 : index
    %c0_43 = arith.constant 0 : index
    %54 = vector.load %arg5[%c2_41, %c0_42, %c0_43] : memref<3x128x128xbf16, #tpu.memory_space<vmem>>, vector<1x128x128xbf16>
    %55 = vector.shape_cast %54 : vector<1x128x128xbf16> to vector<128x128xbf16>
    %cst_44 = arith.constant dense<0.000000e+00> : vector<8x128xf32>
    %56 = tpu.matmul %53, %55, %cst_44 {dimension_numbers = #tpu.dot_dimension_numbers<[1], [0], [0], [1], [0, 0, 1, 1], [], []>} : vector<8x128xbf16>, vector<128x128xbf16>, vector<8x128xf32> -> vector<8x128xf32>
    %57 = arith.addf %39, %56 : vector<8x128xf32>
    %c0_45 = arith.constant 0 : index
    %c0_46 = arith.constant 0 : index
    %58 = vector.load %arg6[%c0_45, %c0_46] : memref<1x128xf32, #tpu.memory_space<vmem>>, vector<1x128xf32>
    %59 = vector.broadcast %58 : vector<1x128xf32> to vector<8x128xf32>
    %60 = arith.addf %57, %59 : vector<8x128xf32>
    %cst_47 = arith.constant 0.000000e+00 : f32
    %61 = vector.broadcast %cst_47 : f32 to vector<8x128xf32>
    %62 = arith.maximumf %60, %61 : vector<8x128xf32>
    %63 = arith.truncf %62 : vector<8x128xf32> to vector<8x128xbf16>
    %c0_48 = arith.constant 0 : index
    %c0_49 = arith.constant 0 : index
    %64 = vector.load %arg7[%c0_48, %c0_49] : memref<128x128xbf16, #tpu.memory_space<vmem>>, vector<128x128xbf16>
    %cst_50 = arith.constant dense<0.000000e+00> : vector<8x128xf32>
    %65 = tpu.matmul %63, %64, %cst_50 {dimension_numbers = #tpu.dot_dimension_numbers<[1], [0], [0], [1], [0, 0, 1, 1], [], []>} : vector<8x128xbf16>, vector<128x128xbf16>, vector<8x128xf32> -> vector<8x128xf32>
    %c0_51 = arith.constant 0 : index
    %c0_52 = arith.constant 0 : index
    %66 = vector.load %arg8[%c0_51, %c0_52] : memref<1x128xf32, #tpu.memory_space<vmem>>, vector<1x128xf32>
    %67 = vector.broadcast %66 : vector<1x128xf32> to vector<8x128xf32>
    %68 = arith.addf %65, %67 : vector<8x128xf32>
    %69 = tpu.iota {dimensions = array<i32: 1>} : vector<8x128xi32>
    %c4_i32 = arith.constant 4 : i32
    %70 = vector.broadcast %c4_i32 : i32 to vector<8x128xi32>
    %71 = arith.cmpi slt, %69, %70 : vector<8x128xi32>
    %cst_53 = arith.constant -1.000000e+30 : f32
    %72 = vector.broadcast %cst_53 : f32 to vector<8x128xf32>
    %73 = arith.select %71, %68, %72 : vector<8x128xi1>, vector<8x128xf32>
    %cst_54 = arith.constant dense<0xFF800000> : vector<8xf32>
    %74 = vector.multi_reduction <maximumf>, %73, %cst_54 [1] : vector<8x128xf32> to vector<8xf32>
    %75 = vector.shape_cast %74 : vector<8xf32> to vector<8x1xf32>
    %76 = vector.broadcast %75 : vector<8x1xf32> to vector<8x128xf32>
    %77 = arith.subf %73, %76 : vector<8x128xf32>
    %78 = math.exp %77 : vector<8x128xf32>
    %cst_55 = arith.constant dense<0.000000e+00> : vector<8xf32>
    %79 = vector.multi_reduction <add>, %78, %cst_55 [1] : vector<8x128xf32> to vector<8xf32>
    %80 = vector.shape_cast %79 : vector<8xf32> to vector<8x1xf32>
    %81 = math.log %80 : vector<8x1xf32>
    %82 = vector.broadcast %81 : vector<8x1xf32> to vector<8x128xf32>
    %83 = arith.subf %77, %82 : vector<8x128xf32>
    %c0_56 = arith.constant 0 : index
    %c0_57 = arith.constant 0 : index
    %84 = vector.load %arg9[%c0_56, %c0_57] : memref<8x128xf32, #tpu.memory_space<vmem>>, vector<8x128xf32>
    tpu.vector_store %arg9[%c0_56, %c0_57], %83 {strides = array<i32>} : memref<8x128xf32, #tpu.memory_space<vmem>>, vector<8x128xf32>,
    return
  }
}

</mosaic_0001>

<bundles_post_ra>
// kernel: tpu_custom_call.1
= control target key start
LH: loop header
LB: loop body
LE: loop exit
PB: predicated region body
PF: predicated region fallthrough
CT: control target
= control target key end

     0   :  { %14 = vsyncpa [#allocation3], 0  ;;  %s2769_s0 = inlined_call_operand.hbm [shape: bf16[128,128], index: 0, kind: input, shape index: {}]   ;;  %s2770_s1 = inlined_call_operand.hbm [shape: bf16[128,128], index: 1, kind: input, shape index: {}]   ;;  %s2771_s2 = inlined_call_operand.hbm [shape: bf16[3,128,128], index: 2, kind: input, shape index: {}]   ;;  %s2772_s3 = inlined_call_operand.vmem [shape: f32[3,1,128], index: 3, kind: input, shape index: {}]   ;;  %s2773_s4 = inlined_call_operand.vmem [shape: bf16[8,128], index: 4, kind: input, shape index: {}]   ;;  %s2774_s5 = inlined_call_operand.hbm [shape: bf16[3,128,128], index: 5, kind: input, shape index: {}]   ;;  %s2775_s6 = inlined_call_operand.vmem [shape: f32[1,128], index: 6, kind: input, shape index: {}]   ;;  %s2776_s7 = inlined_call_operand.hbm [shape: bf16[128,128], index: 7, kind: input, shape index: {}]   ;;  %s2777_s8 = inlined_call_operand.vmem [shape: f32[1,128], index: 8, kind: input, shape index: {}]   ;;  %s2778_s9 = inlined_call_operand.hbm [shape: f32[8,128], index: 9, kind: output, shape index: {}]  }
   0x1   :  { %15 = vsyncpa [#allocation6], 0 }
   0x2   :  { %16 = vsyncpa [#allocation9], 0 }
   0x3   :  { %17 = vsyncpa [#allocation4], 0  ;;  %s2501_s30 = smov [#allocation5]   ;;  %s2502_s11 = smov [#allocation8]  }
   0x4   :  { %s35_s10 = sshll.u32 %s2501_s30, 4  ;;  %s63_s12 = sshll.u32 %s2502_s11, 4  ;;  %s36_s10 = int_to_ptr.vmem [resolvable:$true] %s35_s10  ;;  %s64_s12 = int_to_ptr.vmem [resolvable:$true] %s63_s12 }
   0x5   :  { %s2381_s13 = scalar_lea.vmem %s36_s10, 1024  ;;  %p2386_p1 = scmp.lt.s32.totalorder %s36_s10, %s36_s10 }
   0x6   :  { %p2382_p0 = scmp.ne.s32.totalorder %s36_s10, %s2381_s13  ;;  %p2387_p2 = scmp.lt.s32.totalorder %s2381_s13, %s2381_s13 }
   0x8   :  { %p2388_p3 = por %p2387_p2, %p2386_p1 }
   0xa   :  { %p2389_p4 = pnand %p2388_p3, %p2382_p0 }
   0xc   :  { %2392 = shalt.err (!%p2389_p4)
}
   0xd   :  { %s2503_s14 = smov 64   ;;  %s2504_s15 = smov 4  }
   0xe   :  { %41 = dma.hbm_to_vmem [thread:$0]  %s2770_s1, 1024, %s36_s10, [#allocation6], %s2503_s14, %s2503_s14, %s2504_s15  }
   0xf   :  { %s2401_s18 = scalar_lea.vmem %s64_s12, 3072  ;;  %p2406_p6 = scmp.lt.s32.totalorder %s64_s12, %s64_s12 }
  0x10   :  { %p2402_p5 = scmp.ne.s32.totalorder %s64_s12, %s2401_s18  ;;  %p2407_p7 = scmp.lt.s32.totalorder %s2401_s18, %s2401_s18 }
  0x12   :  { %p2408_p8 = por %p2407_p7, %p2406_p6 }
  0x14   :  { %p2409_p9 = pnand %p2408_p8, %p2402_p5 }
  0x16   :  { %2412 = shalt.err (!%p2409_p9)
}
  0x17   :  { %69 = dma.hbm_to_vmem [thread:$0]  %s2774_s5, 3072, %s64_s12, [#allocation9], %s2503_s14, %s2503_s14, %s2504_s15  }
  0x18   :  { %s2505_s21 = smov [#allocation2]   ;;  %s2506_s23 = smov [#allocation7]  }
  0x19   :  { %s23_s22 = sshll.u32 %s2505_s21, 4  ;;  %s47_s24 = sshll.u32 %s2506_s23, 4  ;;  %s24_s22 = int_to_ptr.vmem [resolvable:$true] %s23_s22  ;;  %s48_s24 = int_to_ptr.vmem [resolvable:$true] %s47_s24 }
  0x1a   :  { %s2421_s1 = scalar_lea.vmem %s24_s22, 1024  ;;  %p2426_p11 = scmp.lt.s32.totalorder %s24_s22, %s24_s22 }
  0x1b   :  { %p2422_p10 = scmp.ne.s32.totalorder %s24_s22, %s2421_s1  ;;  %p2427_p12 = scmp.lt.s32.totalorder %s2421_s1, %s2421_s1 }
  0x1d   :  { %p2428_p13 = por %p2427_p12, %p2426_p11 }
  0x1f   :  { %p2429_p0 = pnand %p2428_p13, %p2422_p10 }
  0x21   :  { %2432 = shalt.err (!%p2429_p0)
}
  0x22   :  { %29 = dma.hbm_to_vmem [thread:$0]  %s2769_s0, 1024, %s24_s22, [#allocation3], %s2503_s14, %s2503_s14, %s2504_s15  }
  0x23   :  { %s2441_s5 = scalar_lea.vmem %s48_s24, 3072  ;;  %p2446_p2 = scmp.lt.s32.totalorder %s48_s24, %s48_s24 }
  0x24   :  { %p2442_p1 = scmp.ne.s32.totalorder %s48_s24, %s2441_s5  ;;  %p2447_p3 = scmp.lt.s32.totalorder %s2441_s5, %s2441_s5 }
  0x26   :  { %p2448_p4 = por %p2447_p3, %p2446_p2 }
  0x28   :  { %p2449_p5 = pnand %p2448_p4, %p2442_p1 }
  0x2a   :  { %2452 = shalt.err (!%p2449_p5)
}
  0x2b   :  { %53 = dma.hbm_to_vmem [thread:$0]  %s2771_s2, 3072, %s48_s24, [#allocation6], %s2503_s14, %s2503_s14, %s2504_s15  }
  0x2c   :  { %s2507_s29 = smov [#allocation10]  }
  0x2d   :  { %s77_s30 = sshll.u32 %s2507_s29, 4  ;;  %s78_s30 = int_to_ptr.vmem [resolvable:$true] %s77_s30 }
  0x2e   :  { %s2461_s10 = scalar_lea.vmem %s78_s30, 1024  ;;  %p2466_p7 = scmp.lt.s32.totalorder %s78_s30, %s78_s30 }
  0x2f   :  { %p2462_p6 = scmp.ne.s32.totalorder %s78_s30, %s2461_s10  ;;  %p2467_p8 = scmp.lt.s32.totalorder %s2461_s10, %s2461_s10 }
  0x31   :  { %p2468_p9 = por %p2467_p8, %p2466_p7 }
  0x33   :  { %p2469_p10 = pnand %p2468_p9, %p2462_p6 }
  0x35   :  { %2472 = shalt.err (!%p2469_p10)
}
  0x36   :  { %83 = dma.hbm_to_vmem [thread:$0]  %s2776_s7, 1024, %s78_s30, [#allocation9], %s2503_s14, %s2503_s14, %s2504_s15  }
  0x37   :  { %2493 = dma.done.wait [#allocation3], 1024  }
  0x38   :  { %2494 = vsyncadd [#allocation3], 4294966272 }
  0x39   :  { %2495 = dma.done.wait [#allocation6], 4096  }
  0x3a   :  { %2496 = vsyncadd [#allocation6], 4294963200 }
  0x3b   :  { %2497 = dma.done.wait [#allocation9], 4096  }
  0x3c   :  { %2498 = vsyncadd [#allocation9], 4294963200  ;;  %v2297_v0 = vld [vmem:[#allocation7 + $0x38] sm:$0xff]   ;;  %v2298_v1 = vld [vmem:[#allocation7 + $0x30] sm:$0xff]   ;;  %v2508_v56 = vmov 0.0   ;;  %vm2509_vm0 = vmmov 0  }
  0x3d   :  { %1955 = vmatprep.subr.bf16.mxu0 %v2297_v0  ;;  %v2299_v2 = vld [vmem:[#allocation7 + $0x28] sm:$0xff]   ;;  %v2300_v3 = vld [vmem:[#allocation7 + $0x20] sm:$0xff]   ;;  %v2301_v5 = vld [vmem:[#allocation7 + $0x18] sm:$0xff]  }
  0x3e   :  { %1956 = vmatpush3.bf16.msra.mxu0 %v2297_v0  ;;  %v2305_v4 = vld [vmem:[#allocation5] sm:$0xff]   ;;  %v2302_v6 = vld [vmem:[#allocation7 + $0x10] sm:$0xff]   ;;  %v2303_v7 = vld [vmem:[#allocation7 + $0x8] sm:$0xff]  }
  0x3f   :  { %1957 = vmatprep.subr.bf16.mxu0 %v2298_v1  ;;  %1971 = vmatprep.mubr.bf16.mxu0 %v2305_v4  ;;  %v2304_v8 = vld [vmem:[#allocation7] sm:$0xff]   ;;  %v2306_v9 = vld [vmem:[#allocation5 + $0x8] sm:$0xff]   ;;  %v2307_v10 = vld [vmem:[#allocation5 + $0x10] sm:$0xff]  }
  0x40   :  { %v2308_v11 = vld [vmem:[#allocation5 + $0x18] sm:$0xff]   ;;  %v2309_v12 = vld [vmem:[#allocation5 + $0x20] sm:$0xff]   ;;  %v2310_v13 = vld [vmem:[#allocation5 + $0x28] sm:$0xff]  }
  0x41   :  { %v2311_v14 = vld [vmem:[#allocation5 + $0x30] sm:$0xff]   ;;  %v2312_v15 = vld [vmem:[#allocation5 + $0x38] sm:$0xff]   ;;  %v2591_v16 = vld [vmem:[#allocation2] sm:$0xff]  }
  0x42   :  { %1958 = vmatpush3.bf16.msra.mxu0 %v2298_v1  ;;  %2003 = vmatprep.mubr.bf16.mxu1 %v2591_v16  ;;  %v2321_v41 = vld [vmem:[#allocation7 + $0x78] sm:$0xff]   ;;  %v2594_v42 = vld [vmem:[#allocation2 + $0x8] sm:$0xff]   ;;  %v2596_v43 = vld [vmem:[#allocation2 + $0x10] sm:$0xff]  }
  0x43   :  { %1959 = vmatprep.subr.bf16.mxu0 %v2299_v2  ;;  %v2322_v44 = vld [vmem:[#allocation7 + $0x70] sm:$0xff]   ;;  %v2323_v45 = vld [vmem:[#allocation7 + $0x68] sm:$0xff]   ;;  %v2600_v46 = vld [vmem:[#allocation2 + $0x18] sm:$0xff]  }
  0x44   :  { %v2602_v47 = vld [vmem:[#allocation2 + $0x20] sm:$0xff]   ;;  %v2325_v49 = vld [vmem:[#allocation7 + $0x58] sm:$0xff]   ;;  %v2606_v50 = vld [vmem:[#allocation2 + $0x28] sm:$0xff]  }
  0x45   :  { %v2324_v48 = vld [vmem:[#allocation7 + $0x60] sm:$0xff]   ;;  %v2608_v51 = vld [vmem:[#allocation2 + $0x30] sm:$0xff]   ;;  %v2612_v52 = vld [vmem:[#allocation2 + $0x38] sm:$0xff]  }
  0x46   :  { %1960 = vmatpush3.bf16.msra.mxu0 %v2299_v2  ;;  %v2326_v53 = vld [vmem:[#allocation7 + $0x50] sm:$0xff]   ;;  %v2327_v54 = vld [vmem:[#allocation7 + $0x48] sm:$0xff]   ;;  %v2328_v55 = vld [vmem:[#allocation7 + $0x40] sm:$0xff]  }
  0x47   :  { %1961 = vmatprep.subr.bf16.mxu0 %v2300_v3  ;;  %v1733_v59 = vld [vmem:[%s2772_s3] ss:$0 sm:$0xff] }
  0x4a   :  { %1962 = vmatpush3.bf16.msra.mxu0 %v2300_v3 }
  0x4b   :  { %1963 = vmatprep.subr.bf16.mxu0 %v2301_v5 }
  0x4e   :  { %1964 = vmatpush3.bf16.msra.mxu0 %v2301_v5 }
  0x4f   :  { %1965 = vmatprep.subr.bf16.mxu0 %v2302_v6 }
  0x52   :  { %1966 = vmatpush3.bf16.msra.mxu0 %v2302_v6 }
  0x53   :  { %1967 = vmatprep.subr.bf16.mxu0 %v2303_v7 }
  0x56   :  { %1968 = vmatpush3.bf16.msra.mxu0 %v2303_v7 }
  0x57   :  { %1969 = vmatprep.subr.bf16.mxu0 %v2304_v8 }
  0x5a   :  { %1970 = vmatpush3.bf16.msra.mxu0 %v2304_v8 }
  0x5b   :  { %2019 = vmatprep.subr.bf16.mxu0 %v2508_v56 }
  0x5d   :  { %1972 = vmatmul.mubr.bf16.vlgmr.msra.gmra.mxu0 %v2306_v9 }
  0x5e   :  { %1975 = vmatprep.mubr.bf16.mxu0 %v2307_v10 }
  0x65   :  { %1976 = vmatmul.mubr.bf16.gmra.mxu0 %v2308_v11 }
  0x66   :  { %1979 = vmatprep.mubr.bf16.mxu0 %v2309_v12 }
  0x6d   :  { %1980 = vmatmul.mubr.bf16.gmra.mxu0 %v2310_v13 }
  0x6e   :  { %1983 = vmatprep.mubr.bf16.mxu0 %v2311_v14 }
  0x75   :  { %1984 = vmatmul.mubr.bf16.gmra.mxu0 %v2312_v15 }
  0x76   :  { %2035 = vmatprep.mubr.msk.bf16.mxu0 %vm2509_vm0, %v2508_v56 }
 0x11d   :  { %v1973_v17 = vpop.f32.mrf.mxu0 }
 0x11f   :  { %v281_v18 = vpop.f32.mrf.mxu0 }
 0x121   :  { %v1974_v19 = vpop.f32.mrf.mxu0 }
 0x122   :  { %v345_v39 = vpack.c.bf16 %v1974_v19, %v1973_v17 }
 0x123   :  { %v284_v20 = vpop.f32.mrf.mxu0 }
 0x124   :  { %v344_v40 = vpack.c.bf16 %v284_v20, %v281_v18 }
 0x125   :  { %v1977_v21 = vpop.f32.mrf.mxu0 }
 0x127   :  { %v297_v22 = vpop.f32.mrf.mxu0 }
 0x129   :  { %v1978_v23 = vpop.f32.mrf.mxu0 }
 0x12a   :  { %v347_v37 = vpack.c.bf16 %v1978_v23, %v1977_v21 }
 0x12b   :  { %v300_v24 = vpop.f32.mrf.mxu0 }
 0x12c   :  { %v346_v38 = vpack.c.bf16 %v300_v24, %v297_v22 }
 0x12d   :  { %v1981_v25 = vpop.f32.mrf.mxu0 }
 0x12f   :  { %v313_v26 = vpop.f32.mrf.mxu0 }
 0x131   :  { %v1982_v27 = vpop.f32.mrf.mxu0 }
 0x132   :  { %v349_v35 = vpack.c.bf16 %v1982_v27, %v1981_v25 }
 0x133   :  { %v316_v28 = vpop.f32.mrf.mxu0 }
 0x134   :  { %v348_v36 = vpack.c.bf16 %v316_v28, %v313_v26 }
 0x135   :  { %v1985_v29 = vpop.f32.mrf.mxu0 }
 0x137   :  { %v329_v30 = vpop.f32.mrf.mxu0 }
 0x139   :  { %v1986_v31 = vpop.f32.mrf.mxu0 }
 0x13a   :  { %v351_v32 = vpack.c.bf16 %v1986_v31, %v1985_v29 }
 0x13b   :  { %v332_v33 = vpop.f32.mrf.mxu0 }
 0x13c   :  { %v350_v34 = vpack.c.bf16 %v332_v33, %v329_v30  ;;  %1987 = vmatprep.subr.bf16.mxu1 %v351_v32 }
 0x13d   :  { %1988 = vmatpush3.bf16.msra.mxu1 %v351_v32 }
 0x13e   :  { %1989 = vmatprep.subr.bf16.mxu1 %v350_v34 }
 0x141   :  { %1990 = vmatpush3.bf16.msra.mxu1 %v350_v34 }
 0x142   :  { %1991 = vmatprep.subr.bf16.mxu1 %v349_v35 }
 0x145   :  { %1992 = vmatpush3.bf16.msra.mxu1 %v349_v35 }
 0x146   :  { %1993 = vmatprep.subr.bf16.mxu1 %v348_v36 }
 0x149   :  { %1994 = vmatpush3.bf16.msra.mxu1 %v348_v36 }
 0x14a   :  { %1995 = vmatprep.subr.bf16.mxu1 %v347_v37 }
 0x14d   :  { %1996 = vmatpush3.bf16.msra.mxu1 %v347_v37 }
 0x14e   :  { %1997 = vmatprep.subr.bf16.mxu1 %v346_v38 }
 0x151   :  { %1998 = vmatpush3.bf16.msra.mxu1 %v346_v38 }
 0x152   :  { %1999 = vmatprep.subr.bf16.mxu1 %v345_v39 }
 0x155   :  { %2000 = vmatpush3.bf16.msra.mxu1 %v345_v39 }
 0x156   :  { %2001 = vmatprep.subr.bf16.mxu1 %v344_v40 }
 0x159   :  { %2002 = vmatpush3.bf16.msra.mxu1 %v344_v40 }
 0x15a   :  { %2039 = vmatprep.subr.bf16.mxu1 %v2321_v41 }
 0x15c   :  { %2004 = vmatmul.mubr.bf16.vlgmr.msra.gmra.mxu1 %v2594_v42 }
 0x15d   :  { %2007 = vmatprep.mubr.bf16.mxu1 %v2596_v43  ;;  %2040 = vmatpush3.bf16.msra.mxu1 %v2321_v41 }
 0x15e   :  { %2041 = vmatprep.subr.bf16.mxu1 %v2322_v44 }
 0x161   :  { %2042 = vmatpush3.bf16.msra.mxu1 %v2322_v44 }
 0x162   :  { %2043 = vmatprep.subr.bf16.mxu1 %v2323_v45 }
 0x164   :  { %2008 = vmatmul.mubr.bf16.gmra.mxu1 %v2600_v46 }
 0x165   :  { %2011 = vmatprep.mubr.bf16.mxu1 %v2602_v47  ;;  %2044 = vmatpush3.bf16.msra.mxu1 %v2323_v45 }
 0x166   :  { %2045 = vmatprep.subr.bf16.mxu1 %v2324_v48 }
 0x169   :  { %2046 = vmatpush3.bf16.msra.mxu1 %v2324_v48 }
 0x16a   :  { %2047 = vmatprep.subr.bf16.mxu1 %v2325_v49 }
 0x16c   :  { %2012 = vmatmul.mubr.bf16.gmra.mxu1 %v2606_v50 }
 0x16d   :  { %2015 = vmatprep.mubr.bf16.mxu1 %v2608_v51  ;;  %2048 = vmatpush3.bf16.msra.mxu1 %v2325_v49 }
 0x16e   :  { %2049 = vmatprep.subr.bf16.mxu1 %v2326_v53 }
 0x171   :  { %2050 = vmatpush3.bf16.msra.mxu1 %v2326_v53 }
 0x172   :  { %2051 = vmatprep.subr.bf16.mxu1 %v2327_v54 }
 0x174   :  { %2016 = vmatmul.mubr.bf16.gmra.mxu1 %v2612_v52 }
 0x175   :  { %2052 = vmatpush3.bf16.msra.mxu1 %v2327_v54 }
 0x176   :  { %2053 = vmatprep.subr.bf16.mxu1 %v2328_v55 }
 0x179   :  { %2054 = vmatpush3.bf16.msra.mxu1 %v2328_v55 }
 0x17a   :  { %2103 = vmatprep.subr.bf16.mxu1 %v2508_v56 }
 0x21c   :  { %v2005_v57 = vpop.f32.mrf.mxu1 }
 0x21d   :  { %v450_v63 = vadd.f32 %v2005_v57, %v1733_v59 }
 0x21e   :  { %v441_v58 = vpop.f32.mrf.mxu1 }
 0x21f   :  { %v442_v61 = vadd.f32 %v1733_v59, %v441_v58  ;;  %v506_v6 = vmax.f32 %v450_v63, 0.0 }
 0x220   :  { %v2006_v60 = vpop.f32.mrf.mxu1 }
 0x221   :  { %v453_v62 = vadd.f32 %v2006_v60, %v1733_v59  ;;  %v504_v4 = vmax.f32 %v442_v61, 0.0 }
 0x222   :  { %v444_v0 = vpop.f32.mrf.mxu1 }
 0x223   :  { %v445_v1 = vadd.f32 %v1733_v59, %v444_v0  ;;  %v507_v2 = vmax.f32 %v453_v62, 0.0 }
 0x224   :  { %v2009_v3 = vpop.f32.mrf.mxu1 }
 0x225   :  { %v505_v5 = vmax.f32 %v445_v1, 0.0  ;;  %v521_v9 = vpack.c.bf16 %v507_v2, %v506_v6  ;;  %v466_v13 = vadd.f32 %v2009_v3, %v1733_v59 }
 0x226   :  { %v457_v7 = vpop.f32.mrf.mxu1 }
 0x227   :  { %v2620_v8 = vpack.c.bf16 %v505_v5, %v504_v4  ;;  %v458_v11 = vadd.f32 %v1733_v59, %v457_v7  ;;  %v510_v21 = vmax.f32 %v466_v13, 0.0 }
 0x228   :  { %v2010_v10 = vpop.f32.mrf.mxu1 }
 0x229   :  { %v469_v12 = vadd.f32 %v2010_v10, %v1733_v59  ;;  %2055 = vmatprep.mubr.bf16.mxu1 %v2620_v8  ;;  %v508_v19 = vmax.f32 %v458_v11, 0.0 }
 0x22a   :  { %v460_v14 = vpop.f32.mrf.mxu1  ;;  %2056 = vmatmul.mubr.bf16.vlgmr.msra.gmra.mxu1 %v521_v9 }
 0x22b   :  { %v461_v15 = vadd.f32 %v1733_v59, %v460_v14  ;;  %v511_v17 = vmax.f32 %v469_v12, 0.0 }
 0x22c   :  { %v2013_v18 = vpop.f32.mrf.mxu1 }
 0x22d   :  { %v509_v20 = vmax.f32 %v461_v15, 0.0  ;;  %v523_v24 = vpack.c.bf16 %v511_v17, %v510_v21  ;;  %v482_v28 = vadd.f32 %v2013_v18, %v1733_v59 }
 0x22e   :  { %v473_v22 = vpop.f32.mrf.mxu1 }
 0x22f   :  { %v522_v23 = vpack.c.bf16 %v509_v20, %v508_v19  ;;  %v474_v26 = vadd.f32 %v1733_v59, %v473_v22  ;;  %v514_v35 = vmax.f32 %v482_v28, 0.0  ;;  %v2340_v28 = vld [vmem:[#allocation8 + $0x60] sm:$0xff]  }
 0x230   :  { %v2014_v25 = vpop.f32.mrf.mxu1 }
 0x231   :  { %v485_v27 = vadd.f32 %v2014_v25, %v1733_v59  ;;  %2059 = vmatprep.mubr.bf16.mxu1 %v522_v23  ;;  %v512_v33 = vmax.f32 %v474_v26, 0.0  ;;  %v2337_v25 = vld [vmem:[#allocation8 + $0x78] sm:$0xff]   ;;  %v2338_v26 = vld [vmem:[#allocation8 + $0x70] sm:$0xff]  }
 0x232   :  { %v476_v29 = vpop.f32.mrf.mxu1  ;;  %2060 = vmatmul.mubr.bf16.gmra.mxu1 %v523_v24 }
 0x233   :  { %v477_v30 = vadd.f32 %v1733_v59, %v476_v29  ;;  %v515_v31 = vmax.f32 %v485_v27, 0.0  ;;  %v2339_v27 = vld [vmem:[#allocation8 + $0x68] sm:$0xff]   ;;  %v2341_v29 = vld [vmem:[#allocation8 + $0x58] sm:$0xff]  }
 0x234   :  { %v2017_v32 = vpop.f32.mrf.mxu1 }
 0x235   :  { %v513_v34 = vmax.f32 %v477_v30, 0.0  ;;  %v498_v38 = vadd.f32 %v2017_v32, %v1733_v59  ;;  %v525_v39 = vpack.c.bf16 %v515_v31, %v514_v35  ;;  %v2342_v30 = vld [vmem:[#allocation8 + $0x50] sm:$0xff]   ;;  %v2343_v31 = vld [vmem:[#allocation8 + $0x48] sm:$0xff]   ;;  %v2344_v32 = vld [vmem:[#allocation8 + $0x40] sm:$0xff]  }
 0x236   :  { %v489_v36 = vpop.f32.mrf.mxu1 }
 0x237   :  { %v524_v37 = vpack.c.bf16 %v513_v34, %v512_v33  ;;  %v490_v41 = vadd.f32 %v1733_v59, %v489_v36  ;;  %v518_v48 = vmax.f32 %v498_v38, 0.0 }
 0x238   :  { %v2018_v40 = vpop.f32.mrf.mxu1 }
 0x239   :  { %v501_v44 = vadd.f32 %v2018_v40, %v1733_v59  ;;  %2063 = vmatprep.mubr.bf16.mxu1 %v524_v37  ;;  %v516_v54 = vmax.f32 %v490_v41, 0.0 }
 0x23a   :  { %v492_v45 = vpop.f32.mrf.mxu1  ;;  %2064 = vmatmul.mubr.bf16.gmra.mxu1 %v525_v39 }
 0x23b   :  { %v519_v49 = vmax.f32 %v501_v44, 0.0  ;;  %v493_v53 = vadd.f32 %v1733_v59, %v492_v45  ;;  %v2634_v59 = vld [vmem:[%s2773_s4] sm:$0xf] }
 0x23d   :  { %v527_v55 = vpack.c.bf16 %v519_v49, %v518_v48  ;;  %v517_v57 = vmax.f32 %v493_v53, 0.0  ;;  %v1751_v53 = vld [vmem:[%s2772_s3 + $0x1] ss:$0 sm:$0xff] }
 0x23f   :  { %v526_v58 = vpack.c.bf16 %v517_v57, %v516_v54  ;;  %2020 = vmatpush3.bf16.msra.mxu0 %v527_v55 }
 0x240   :  { %2021 = vmatprep.subr.bf16.mxu0 %v2508_v56 }
 0x241   :  { %2067 = vmatprep.mubr.bf16.mxu1 %v526_v58 }
 0x242   :  { %2068 = vmatmul.mubr.bf16.gmra.mxu1 %v527_v55 }
 0x243   :  { %2022 = vmatpush3.bf16.msra.mxu0 %v526_v58  ;;  %2119 = vmatprep.mubr.msk.bf16.mxu1 %vm2509_vm0, %v2508_v56 }
 0x244   :  { %2023 = vmatprep.subr.bf16.mxu0 %v2508_v56 }
 0x247   :  { %2024 = vmatpush3.bf16.msra.mxu0 %v525_v39 }
 0x248   :  { %2025 = vmatprep.subr.bf16.mxu0 %v2508_v56 }
 0x24b   :  { %2026 = vmatpush3.bf16.msra.mxu0 %v524_v37 }
 0x24c   :  { %2027 = vmatprep.subr.bf16.mxu0 %v2508_v56 }
 0x24f   :  { %2028 = vmatpush3.bf16.msra.mxu0 %v523_v24 }
 0x250   :  { %2029 = vmatprep.subr.bf16.mxu0 %v2508_v56 }
 0x253   :  { %2030 = vmatpush3.bf16.msra.mxu0 %v522_v23 }
 0x254   :  { %2031 = vmatprep.subr.bf16.mxu0 %v2508_v56 }
 0x257   :  { %2032 = vmatpush3.bf16.msra.mxu0 %v521_v9 }
 0x258   :  { %2033 = vmatprep.subr.bf16.mxu0 %v2508_v56 }
 0x25b   :  { %2034 = vmatpush3.bf16.msra.mxu0 %v2620_v8 }
 0x25e   :  { %2036 = vmatmul.mubr.bf16.vlgmr.msra.gmra.mxu0 %v2634_v59 }
 0x25f   :  { %2087 = vmatprep.mubr.bf16.mxu0 %v2591_v16 }
 0x2ea   :  { %v2057_v60 = vpop.f32.mrf.mxu1 }
 0x2ec   :  { %v684_v61 = vpop.f32.mrf.mxu1 }
 0x2ee   :  { %v2058_v62 = vpop.f32.mrf.mxu1 }
 0x2ef   :  { %v748_v19 = vpack.c.bf16 %v2058_v62, %v2057_v60 }
 0x2f0   :  { %v687_v63 = vpop.f32.mrf.mxu1 }
 0x2f1   :  { %v747_v20 = vpack.c.bf16 %v687_v63, %v684_v61 }
 0x2f2   :  { %v2061_v0 = vpop.f32.mrf.mxu1 }
 0x2f4   :  { %v700_v1 = vpop.f32.mrf.mxu1 }
 0x2f6   :  { %v2062_v2 = vpop.f32.mrf.mxu1 }
 0x2f7   :  { %v750_v17 = vpack.c.bf16 %v2062_v2, %v2061_v0 }
 0x2f8   :  { %v703_v3 = vpop.f32.mrf.mxu1 }
 0x2f9   :  { %v749_v18 = vpack.c.bf16 %v703_v3, %v700_v1 }
 0x2fa   :  { %v2065_v4 = vpop.f32.mrf.mxu1 }
 0x2fc   :  { %v716_v5 = vpop.f32.mrf.mxu1 }
 0x2fe   :  { %v2066_v6 = vpop.f32.mrf.mxu1 }
 0x2ff   :  { %v752_v14 = vpack.c.bf16 %v2066_v6, %v2065_v4 }
 0x300   :  { %v719_v7 = vpop.f32.mrf.mxu1 }
 0x301   :  { %v751_v15 = vpack.c.bf16 %v719_v7, %v716_v5 }
 0x302   :  { %v2069_v8 = vpop.f32.mrf.mxu1 }
 0x304   :  { %v732_v9 = vpop.f32.mrf.mxu1 }
 0x306   :  { %v2070_v10 = vpop.f32.mrf.mxu1 }
 0x307   :  { %v754_v11 = vpack.c.bf16 %v2070_v10, %v2069_v8 }
 0x308   :  { %v735_v12 = vpop.f32.mrf.mxu1 }
 0x309   :  { %v753_v13 = vpack.c.bf16 %v735_v12, %v732_v9  ;;  %2071 = vmatprep.subr.bf16.mxu0 %v754_v11 }
 0x30a   :  { %2072 = vmatpush3.bf16.msra.mxu0 %v754_v11 }
 0x30b   :  { %2073 = vmatprep.subr.bf16.mxu0 %v753_v13 }
 0x30e   :  { %2074 = vmatpush3.bf16.msra.mxu0 %v753_v13 }
 0x30f   :  { %2075 = vmatprep.subr.bf16.mxu0 %v752_v14 }
 0x312   :  { %2076 = vmatpush3.bf16.msra.mxu0 %v752_v14 }
 0x313   :  { %2077 = vmatprep.subr.bf16.mxu0 %v751_v15 }
 0x316   :  { %2078 = vmatpush3.bf16.msra.mxu0 %v751_v15 }
 0x317   :  { %2079 = vmatprep.subr.bf16.mxu0 %v750_v17 }
 0x31a   :  { %2080 = vmatpush3.bf16.msra.mxu0 %v750_v17 }
 0x31b   :  { %2081 = vmatprep.subr.bf16.mxu0 %v749_v18 }
 0x31e   :  { %2082 = vmatpush3.bf16.msra.mxu0 %v749_v18  ;;  %v2652_v21 = vpop.f32.mrf.mxu0 }
 0x31f   :  { %2083 = vmatprep.subr.bf16.mxu0 %v748_v19 }
 0x320   :  { %v2037_v22 = vpop.f32.mrf.mxu0 }
 0x322   :  { %2084 = vmatpush3.bf16.msra.mxu0 %v748_v19  ;;  %v565_v23 = vpop.f32.mrf.mxu0 }
 0x323   :  { %2085 = vmatprep.subr.bf16.mxu0 %v747_v20 }
 0x324   :  { %v2038_v24 = vpop.f32.mrf.mxu0 }
 0x326   :  { %2086 = vmatpush3.bf16.msra.mxu0 %v747_v20 }
 0x327   :  { %2123 = vmatprep.subr.bf16.mxu0 %v2508_v56 }
 0x329   :  { %2088 = vmatmul.mubr.bf16.vlgmr.msra.gmra.mxu0 %v2594_v42 }
 0x32a   :  { %2091 = vmatprep.mubr.bf16.mxu0 %v2596_v43  ;;  %2124 = vmatpush3.bf16.msra.mxu0 %v2337_v25 }
 0x32b   :  { %2125 = vmatprep.subr.bf16.mxu0 %v2508_v56 }
 0x32e   :  { %2126 = vmatpush3.bf16.msra.mxu0 %v2338_v26 }
 0x32f   :  { %2127 = vmatprep.subr.bf16.mxu0 %v2508_v56 }
 0x331   :  { %2092 = vmatmul.mubr.bf16.gmra.mxu0 %v2600_v46 }
 0x332   :  { %2095 = vmatprep.mubr.bf16.mxu0 %v2602_v47  ;;  %2128 = vmatpush3.bf16.msra.mxu0 %v2339_v27 }
 0x333   :  { %2129 = vmatprep.subr.bf16.mxu0 %v2508_v56 }
 0x336   :  { %2130 = vmatpush3.bf16.msra.mxu0 %v2340_v28 }
 0x337   :  { %2131 = vmatprep.subr.bf16.mxu0 %v2508_v56 }
 0x339   :  { %2096 = vmatmul.mubr.bf16.gmra.mxu0 %v2606_v50 }
 0x33a   :  { %2099 = vmatprep.mubr.bf16.mxu0 %v2608_v51  ;;  %2132 = vmatpush3.bf16.msra.mxu0 %v2341_v29 }
 0x33b   :  { %2133 = vmatprep.subr.bf16.mxu0 %v2508_v56 }
 0x33e   :  { %2134 = vmatpush3.bf16.msra.mxu0 %v2342_v30 }
 0x33f   :  { %2135 = vmatprep.subr.bf16.mxu0 %v2508_v56 }
 0x341   :  { %2100 = vmatmul.mubr.bf16.gmra.mxu0 %v2612_v52 }
 0x342   :  { %2139 = vmatprep.mubr.msk.bf16.mxu0 %vm2509_vm0, %v2508_v56  ;;  %2136 = vmatpush3.bf16.msra.mxu0 %v2343_v31 }
 0x343   :  { %2137 = vmatprep.subr.bf16.mxu0 %v2508_v56 }
 0x346   :  { %2138 = vmatpush3.bf16.msra.mxu0 %v2344_v32 }
 0x3e9   :  { %v2089_v33 = vpop.f32.mrf.mxu0 }
 0x3ea   :  { %v806_v26 = vadd.f32 %v2089_v33, %v1751_v53 }
 0x3eb   :  { %v797_v34 = vpop.f32.mrf.mxu0 }
 0x3ec   :  { %v862_v31 = vmax.f32 %v806_v26, 0.0  ;;  %v798_v32 = vadd.f32 %v1751_v53, %v797_v34  ;;  %v2330_v34 = vld [vmem:[#allocation8 + $0x30] sm:$0xff]  }
 0x3ed   :  { %v2090_v35 = vpop.f32.mrf.mxu0 }
 0x3ee   :  { %v809_v23 = vadd.f32 %v2090_v35, %v1751_v53 }
 0x3ef   :  { %v800_v36 = vpop.f32.mrf.mxu0 }
 0x3f0   :  { %v863_v28 = vmax.f32 %v809_v23, 0.0  ;;  %v801_v29 = vadd.f32 %v1751_v53, %v800_v36  ;;  %v2331_v36 = vld [vmem:[#allocation8 + $0x28] sm:$0xff]  }
 0x3f1   :  { %v2093_v37 = vpop.f32.mrf.mxu0 }
 0x3f2   :  { %v822_v14 = vadd.f32 %v2093_v37, %v1751_v53  ;;  %v2688_v35 = vpack.c.bf16 %v863_v28, %v862_v31  ;;  %v861_v37 = vmax.f32 %v801_v29, 0.0 }
 0x3f3   :  { %v813_v38 = vpop.f32.mrf.mxu0 }
 0x3f4   :  { %v866_v20 = vmax.f32 %v822_v14, 0.0  ;;  %v814_v22 = vadd.f32 %v1751_v53, %v813_v38  ;;  %v860_v38 = vmax.f32 %v798_v32, 0.0 }
 0x3f5   :  { %v2094_v39 = vpop.f32.mrf.mxu0 }
 0x3f6   :  { %v825_v11 = vadd.f32 %v2094_v39, %v1751_v53  ;;  %v864_v27 = vmax.f32 %v814_v22, 0.0  ;;  %v876_v33 = vpack.c.bf16 %v861_v37, %v860_v38  ;;  %v2329_v39 = vld [vmem:[#allocation8 + $0x38] sm:$0xff]  }
 0x3f7   :  { %v816_v40 = vpop.f32.mrf.mxu0 }
 0x3f8   :  { %v867_v17 = vmax.f32 %v825_v11, 0.0  ;;  %v817_v18 = vadd.f32 %v1751_v53, %v816_v40  ;;  %v2332_v40 = vld [vmem:[#allocation8 + $0x20] sm:$0xff]  }
 0x3f9   :  { %v2097_v41 = vpop.f32.mrf.mxu0 }
 0x3fa   :  { %v838_v4 = vadd.f32 %v2097_v41, %v1751_v53  ;;  %v2680_v24 = vpack.c.bf16 %v867_v17, %v866_v20  ;;  %v865_v25 = vmax.f32 %v817_v18, 0.0  ;;  %v2333_v41 = vld [vmem:[#allocation8 + $0x18] sm:$0xff]  }
 0x3fb   :  { %v829_v44 = vpop.f32.mrf.mxu0 }
 0x3fc   :  { %v870_v9 = vmax.f32 %v838_v4, 0.0  ;;  %v830_v10 = vadd.f32 %v1751_v53, %v829_v44  ;;  %v2684_v30 = vpack.c.bf16 %v865_v25, %v864_v27  ;;  %v2334_v44 = vld [vmem:[#allocation8 + $0x10] sm:$0xff]  }
 0x3fd   :  { %v2098_v45 = vpop.f32.mrf.mxu0 }
 0x3fe   :  { %v841_v1 = vadd.f32 %v2098_v45, %v1751_v53  ;;  %v868_v15 = vmax.f32 %v830_v10, 0.0  ;;  %v2335_v45 = vld [vmem:[#allocation8 + $0x8] sm:$0xff]  }
 0x3ff   :  { %v832_v48 = vpop.f32.mrf.mxu0 }
 0x400   :  { %v871_v6 = vmax.f32 %v841_v1, 0.0  ;;  %v833_v7 = vadd.f32 %v1751_v53, %v832_v48  ;;  %v2336_v48 = vld [vmem:[#allocation8] sm:$0xff]  }
 0x401   :  { %v2101_v49 = vpop.f32.mrf.mxu0  ;;  %v2352_v1 = vld [vmem:[#allocation7 + $0x80] sm:$0xff]  }
 0x402   :  { %v854_v55 = vadd.f32 %v2101_v49, %v1751_v53  ;;  %v2672_v12 = vpack.c.bf16 %v871_v6, %v870_v9  ;;  %v869_v13 = vmax.f32 %v833_v7, 0.0  ;;  %v568_v49 = vpack.c.bf16 %v2652_v21, %v2652_v21  ;;  %v2349_v21 = vld [vmem:[#allocation7 + $0x98] sm:$0xff]  }
 0x403   :  { %v845_v54 = vpop.f32.mrf.mxu0 }
 0x404   :  { %v874_v61 = vmax.f32 %v854_v55, 0.0  ;;  %v846_v62 = vadd.f32 %v1751_v53, %v845_v54  ;;  %v2676_v19 = vpack.c.bf16 %v869_v13, %v868_v15 }
 0x405   :  { %v2102_v57 = vpop.f32.mrf.mxu0 }
 0x406   :  { %v857_v58 = vadd.f32 %v2102_v57, %v1751_v53  ;;  %v872_v5 = vmax.f32 %v846_v62, 0.0  ;;  %v2346_v57 = vld [vmem:[#allocation7 + $0xb0] sm:$0xff]  }
 0x407   :  { %v848_v60 = vpop.f32.mrf.mxu0 }
 0x408   :  { %v875_v63 = vmax.f32 %v857_v58, 0.0  ;;  %v849_v0 = vadd.f32 %v1751_v53, %v848_v60  ;;  %v2345_v53 = vld [vmem:[#allocation7 + $0xb8] sm:$0xff]  }
 0x409   :  { %2163 = vmatprep.subr.bf16.mxu0 %v2345_v53 }
 0x40a   :  { %v2664_v2 = vpack.c.bf16 %v875_v63, %v874_v61  ;;  %v873_v3 = vmax.f32 %v849_v0, 0.0  ;;  %v2347_v61 = vld [vmem:[#allocation7 + $0xa8] sm:$0xff]   ;;  %v2348_v63 = vld [vmem:[#allocation7 + $0xa0] sm:$0xff]  }
 0x40b   :  { %v2351_v0 = vld [vmem:[#allocation7 + $0x88] sm:$0xff]  }
 0x40c   :  { %2104 = vmatpush3.bf16.msra.mxu1 %v2664_v2  ;;  %v2668_v8 = vpack.c.bf16 %v873_v3, %v872_v5 }
 0x40d   :  { %2105 = vmatprep.subr.bf16.mxu1 %v2508_v56 }
 0x410   :  { %2106 = vmatpush3.bf16.msra.mxu1 %v2668_v8 }
 0x411   :  { %2107 = vmatprep.subr.bf16.mxu1 %v2508_v56 }
 0x414   :  { %2108 = vmatpush3.bf16.msra.mxu1 %v2672_v12 }
 0x415   :  { %2109 = vmatprep.subr.bf16.mxu1 %v2508_v56 }
 0x418   :  { %2110 = vmatpush3.bf16.msra.mxu1 %v2676_v19 }
 0x419   :  { %2111 = vmatprep.subr.bf16.mxu1 %v2508_v56 }
 0x41c   :  { %2112 = vmatpush3.bf16.msra.mxu1 %v2680_v24 }
 0x41d   :  { %2113 = vmatprep.subr.bf16.mxu1 %v2508_v56 }
 0x420   :  { %2114 = vmatpush3.bf16.msra.mxu1 %v2684_v30 }
 0x421   :  { %2115 = vmatprep.subr.bf16.mxu1 %v2508_v56 }
 0x424   :  { %2116 = vmatpush3.bf16.msra.mxu1 %v2688_v35 }
 0x425   :  { %2117 = vmatprep.subr.bf16.mxu1 %v2508_v56 }
 0x428   :  { %2118 = vmatpush3.bf16.msra.mxu1 %v876_v33 }
 0x429   :  { %2143 = vmatprep.subr.bf16.mxu1 %v2508_v56 }
 0x42b   :  { %2120 = vmatmul.mubr.bf16.vlgmr.msra.gmra.mxu1 %v2634_v59 }
 0x42c   :  { %2144 = vmatpush3.bf16.msra.mxu1 %v2329_v39  ;;  %2159 = vmatprep.mubr.msk.bf16.mxu1 %vm2509_vm0, %v2508_v56  ;;  %v2354_v39 = vld [vmem:[#allocation8 + $0xb0] sm:$0xff]  }
 0x42d   :  { %2145 = vmatprep.subr.bf16.mxu1 %v2508_v56 }
 0x430   :  { %2146 = vmatpush3.bf16.msra.mxu1 %v2330_v34 }
 0x431   :  { %2147 = vmatprep.subr.bf16.mxu1 %v2508_v56 }
 0x434   :  { %2148 = vmatpush3.bf16.msra.mxu1 %v2331_v36 }
 0x435   :  { %2149 = vmatprep.subr.bf16.mxu1 %v2508_v56 }
 0x438   :  { %2150 = vmatpush3.bf16.msra.mxu1 %v2332_v40 }
 0x439   :  { %2151 = vmatprep.subr.bf16.mxu1 %v2508_v56 }
 0x43c   :  { %2152 = vmatpush3.bf16.msra.mxu1 %v2333_v41 }
 0x43d   :  { %2153 = vmatprep.subr.bf16.mxu1 %v2508_v56 }
 0x440   :  { %2154 = vmatpush3.bf16.msra.mxu1 %v2334_v44 }
 0x441   :  { %2155 = vmatprep.subr.bf16.mxu1 %v2508_v56 }
 0x444   :  { %2156 = vmatpush3.bf16.msra.mxu1 %v2335_v45 }
 0x445   :  { %2157 = vmatprep.subr.bf16.mxu1 %v2508_v56 }
 0x448   :  { %2158 = vmatpush3.bf16.msra.mxu1 %v2336_v48 }
 0x44b   :  { %2160 = vmatmul.mubr.bf16.vlgmr.msra.gmra.mxu1 %v568_v49 }
 0x44c   :  { %2211 = vmatprep.mubr.bf16.mxu1 %v2591_v16  ;;  %v2350_v16 = vld [vmem:[#allocation7 + $0x90] sm:$0xff]  }
 0x4eb   :  { %v918_v54 = vpop.f32.mrf.mxu1 }
 0x4ec   :  { %v924_v55 = vpack.c.bf16 %v918_v54, %v918_v54 }
 0x4ed   :  { %v2121_v58 = vpop.f32.mrf.mxu1 }
 0x4ee   :  { %2140 = vmatmul.mubr.bf16.vlgmr.msra.gmra.mxu0 %v924_v55 }
 0x4ef   :  { %2164 = vmatpush3.bf16.msra.mxu0 %v2345_v53  ;;  %v921_v60 = vpop.f32.mrf.mxu1  ;;  %2179 = vmatprep.mubr.bf16.mxu0 %v876_v33  ;;  %v2353_v33 = vld [vmem:[#allocation8 + $0xb8] sm:$0xff]  }
 0x4f0   :  { %2165 = vmatprep.subr.bf16.mxu0 %v2346_v57 }
 0x4f1   :  { %v2122_v62 = vpop.f32.mrf.mxu1 }
 0x4f3   :  { %2166 = vmatpush3.bf16.msra.mxu0 %v2346_v57  ;;  %v1777_v57 = vld [vmem:[%s2772_s3 + $0x2] ss:$0 sm:$0xff] }
 0x4f4   :  { %2167 = vmatprep.subr.bf16.mxu0 %v2347_v61 }
 0x4f7   :  { %2168 = vmatpush3.bf16.msra.mxu0 %v2347_v61 }
 0x4f8   :  { %2169 = vmatprep.subr.bf16.mxu0 %v2348_v63 }
 0x4fb   :  { %2170 = vmatpush3.bf16.msra.mxu0 %v2348_v63 }
 0x4fc   :  { %2171 = vmatprep.subr.bf16.mxu0 %v2349_v21 }
 0x4ff   :  { %2172 = vmatpush3.bf16.msra.mxu0 %v2349_v21 }
 0x500   :  { %2173 = vmatprep.subr.bf16.mxu0 %v2350_v16 }
 0x503   :  { %2174 = vmatpush3.bf16.msra.mxu0 %v2350_v16 }
 0x504   :  { %2175 = vmatprep.subr.bf16.mxu0 %v2351_v0 }
 0x507   :  { %2176 = vmatpush3.bf16.msra.mxu0 %v2351_v0 }
 0x508   :  { %2177 = vmatprep.subr.bf16.mxu0 %v2352_v1 }
 0x50b   :  { %2178 = vmatpush3.bf16.msra.mxu0 %v2352_v1  ;;  %v2706_v3 = vpop.f32.mrf.mxu1 }
 0x50c   :  { %2227 = vmatprep.subr.bf16.mxu0 %v2508_v56 }
 0x50d   :  { %v2161_v4 = vpop.f32.mrf.mxu1 }
 0x50e   :  { %2180 = vmatmul.mubr.bf16.vlgmr.msra.gmra.mxu0 %v2688_v35 }
 0x50f   :  { %2183 = vmatprep.mubr.bf16.mxu0 %v2684_v30  ;;  %v1115_v5 = vpop.f32.mrf.mxu1 }
 0x511   :  { %v2162_v6 = vpop.f32.mrf.mxu1 }
 0x516   :  { %2184 = vmatmul.mubr.bf16.gmra.mxu0 %v2680_v24 }
 0x517   :  { %2187 = vmatprep.mubr.bf16.mxu0 %v2676_v19 }
 0x51e   :  { %2188 = vmatmul.mubr.bf16.gmra.mxu0 %v2672_v12 }
 0x51f   :  { %2191 = vmatprep.mubr.bf16.mxu0 %v2668_v8 }
 0x526   :  { %2192 = vmatmul.mubr.bf16.gmra.mxu0 %v2664_v2 }
 0x527   :  { %2243 = vmatprep.mubr.msk.bf16.mxu0 %vm2509_vm0, %v2508_v56 }
 0x5ae   :  { %v2718_v7 = vpop.f32.mrf.mxu0 }
 0x5b0   :  { %v2141_v9 = vpop.f32.mrf.mxu0 }
 0x5b2   :  { %v1027_v10 = vpop.f32.mrf.mxu0 }
 0x5b4   :  { %v2142_v11 = vpop.f32.mrf.mxu0 }
 0x5ce   :  { %v2181_v13 = vpop.f32.mrf.mxu0 }
 0x5d0   :  { %v1217_v14 = vpop.f32.mrf.mxu0 }
 0x5d2   :  { %v2182_v15 = vpop.f32.mrf.mxu0 }
 0x5d3   :  { %v1281_v37 = vpack.c.bf16 %v2182_v15, %v2181_v13 }
 0x5d4   :  { %v1220_v17 = vpop.f32.mrf.mxu0 }
 0x5d5   :  { %v1280_v38 = vpack.c.bf16 %v1220_v17, %v1217_v14 }
 0x5d6   :  { %v2185_v18 = vpop.f32.mrf.mxu0 }
 0x5d8   :  { %v1233_v19 = vpop.f32.mrf.mxu0 }
 0x5da   :  { %v2186_v20 = vpop.f32.mrf.mxu0 }
 0x5db   :  { %v1283_v32 = vpack.c.bf16 %v2186_v20, %v2185_v18 }
 0x5dc   :  { %v1236_v12 = vpop.f32.mrf.mxu0 }
 0x5dd   :  { %v1282_v35 = vpack.c.bf16 %v1236_v12, %v1233_v19 }
 0x5de   :  { %v2189_v22 = vpop.f32.mrf.mxu0 }
 0x5e0   :  { %v1249_v8 = vpop.f32.mrf.mxu0 }
 0x5e2   :  { %v2190_v23 = vpop.f32.mrf.mxu0 }
 0x5e3   :  { %v1285_v30 = vpack.c.bf16 %v2190_v23, %v2189_v22 }
 0x5e4   :  { %v1252_v2 = vpop.f32.mrf.mxu0 }
 0x5e5   :  { %v1284_v31 = vpack.c.bf16 %v1252_v2, %v1249_v8 }
 0x5e6   :  { %v2193_v24 = vpop.f32.mrf.mxu0 }
 0x5e8   :  { %v1265_v25 = vpop.f32.mrf.mxu0 }
 0x5ea   :  { %v2194_v26 = vpop.f32.mrf.mxu0 }
 0x5eb   :  { %v1287_v27 = vpack.c.bf16 %v2194_v26, %v2193_v24 }
 0x5ec   :  { %v1268_v28 = vpop.f32.mrf.mxu0 }
 0x5ed   :  { %v1286_v29 = vpack.c.bf16 %v1268_v28, %v1265_v25  ;;  %2195 = vmatprep.subr.bf16.mxu1 %v1287_v27 }
 0x5ee   :  { %2196 = vmatpush3.bf16.msra.mxu1 %v1287_v27 }
 0x5ef   :  { %2197 = vmatprep.subr.bf16.mxu1 %v1286_v29 }
 0x5f2   :  { %2198 = vmatpush3.bf16.msra.mxu1 %v1286_v29 }
 0x5f3   :  { %2199 = vmatprep.subr.bf16.mxu1 %v1285_v30 }
 0x5f6   :  { %2200 = vmatpush3.bf16.msra.mxu1 %v1285_v30 }
 0x5f7   :  { %2201 = vmatprep.subr.bf16.mxu1 %v1284_v31 }
 0x5fa   :  { %2202 = vmatpush3.bf16.msra.mxu1 %v1284_v31 }
 0x5fb   :  { %2203 = vmatprep.subr.bf16.mxu1 %v1283_v32 }
 0x5fe   :  { %2204 = vmatpush3.bf16.msra.mxu1 %v1283_v32 }
 0x5ff   :  { %2205 = vmatprep.subr.bf16.mxu1 %v1282_v35 }
 0x602   :  { %2206 = vmatpush3.bf16.msra.mxu1 %v1282_v35 }
 0x603   :  { %2207 = vmatprep.subr.bf16.mxu1 %v1281_v37 }
 0x606   :  { %2208 = vmatpush3.bf16.msra.mxu1 %v1281_v37 }
 0x607   :  { %2209 = vmatprep.subr.bf16.mxu1 %v1280_v38 }
 0x60a   :  { %2210 = vmatpush3.bf16.msra.mxu1 %v1280_v38 }
 0x60b   :  { %2247 = vmatprep.subr.bf16.mxu1 %v2508_v56 }
 0x60d   :  { %2212 = vmatmul.mubr.bf16.vlgmr.msra.gmra.mxu1 %v2594_v42  ;;  %v2355_v42 = vld [vmem:[#allocation8 + $0xa8] sm:$0xff]  }
 0x60e   :  { %2215 = vmatprep.mubr.bf16.mxu1 %v2596_v43  ;;  %2248 = vmatpush3.bf16.msra.mxu1 %v2353_v33  ;;  %v2356_v43 = vld [vmem:[#allocation8 + $0xa0] sm:$0xff]  }
 0x60f   :  { %2249 = vmatprep.subr.bf16.mxu1 %v2508_v56 }
 0x612   :  { %2250 = vmatpush3.bf16.msra.mxu1 %v2354_v39 }
 0x613   :  { %2251 = vmatprep.subr.bf16.mxu1 %v2508_v56 }
 0x615   :  { %2216 = vmatmul.mubr.bf16.gmra.mxu1 %v2600_v46  ;;  %v2357_v46 = vld [vmem:[#allocation8 + $0x98] sm:$0xff]  }
 0x616   :  { %2219 = vmatprep.mubr.bf16.mxu1 %v2602_v47  ;;  %2252 = vmatpush3.bf16.msra.mxu1 %v2355_v42  ;;  %v2358_v47 = vld [vmem:[#allocation8 + $0x90] sm:$0xff]  }
 0x617   :  { %2253 = vmatprep.subr.bf16.mxu1 %v2508_v56 }
 0x61a   :  { %2254 = vmatpush3.bf16.msra.mxu1 %v2356_v43 }
 0x61b   :  { %2255 = vmatprep.subr.bf16.mxu1 %v2508_v56 }
 0x61d   :  { %2220 = vmatmul.mubr.bf16.gmra.mxu1 %v2606_v50  ;;  %v2359_v50 = vld [vmem:[#allocation8 + $0x88] sm:$0xff]  }
 0x61e   :  { %2223 = vmatprep.mubr.bf16.mxu1 %v2608_v51  ;;  %2256 = vmatpush3.bf16.msra.mxu1 %v2357_v46  ;;  %v2360_v46 = vld [vmem:[#allocation8 + $0x80] sm:$0xff]  }
 0x61f   :  { %2257 = vmatprep.subr.bf16.mxu1 %v2508_v56 }
 0x622   :  { %2258 = vmatpush3.bf16.msra.mxu1 %v2358_v47  ;;  %v2361_v47 = vld [vmem:[#allocation10 + $0x38] sm:$0xff]  }
 0x623   :  { %2259 = vmatprep.subr.bf16.mxu1 %v2508_v56 }
 0x625   :  { %2224 = vmatmul.mubr.bf16.gmra.mxu1 %v2612_v52 }
 0x626   :  { %2263 = vmatprep.mubr.msk.bf16.mxu1 %vm2509_vm0, %v2508_v56  ;;  %2260 = vmatpush3.bf16.msra.mxu1 %v2359_v50  ;;  %v2362_v50 = vld [vmem:[#allocation10 + $0x30] sm:$0xff]  }
 0x627   :  { %2261 = vmatprep.subr.bf16.mxu1 %v2508_v56 }
 0x62a   :  { %2262 = vmatpush3.bf16.msra.mxu1 %v2360_v46 }
 0x6cd   :  { %v2213_v51 = vpop.f32.mrf.mxu1 }
 0x6ce   :  { %v1339_v29 = vadd.f32 %v2213_v51, %v1777_v57  ;;  %v2363_v51 = vld [vmem:[#allocation10 + $0x28] sm:$0xff]  }
 0x6cf   :  { %v1330_v52 = vpop.f32.mrf.mxu1 }
 0x6d0   :  { %v1395_v37 = vmax.f32 %v1339_v29, 0.0  ;;  %v1331_v38 = vadd.f32 %v1777_v57, %v1330_v52  ;;  %v2364_v52 = vld [vmem:[#allocation10 + $0x20] sm:$0xff]  }
 0x6d1   :  { %v2214_v34 = vpop.f32.mrf.mxu1 }
 0x6d2   :  { %v1342_v26 = vadd.f32 %v2214_v34, %v1777_v57  ;;  %v1393_v42 = vmax.f32 %v1331_v38, 0.0  ;;  %v2366_v34 = vld [vmem:[#allocation10 + $0x10] sm:$0xff]  }
 0x6d3   :  { %v1333_v36 = vpop.f32.mrf.mxu1 }
 0x6d4   :  { %v1396_v31 = vmax.f32 %v1342_v26, 0.0  ;;  %v1334_v32 = vadd.f32 %v1777_v57, %v1333_v36 }
 0x6d5   :  { %v2217_v40 = vpop.f32.mrf.mxu1 }
 0x6d6   :  { %v1355_v12 = vadd.f32 %v2217_v40, %v1777_v57  ;;  %v1410_v33 = vpack.c.bf16 %v1396_v31, %v1395_v37  ;;  %v1394_v39 = vmax.f32 %v1334_v32, 0.0 }
 0x6d7   :  { %v1346_v41 = vpop.f32.mrf.mxu1 }
 0x6d8   :  { %v1399_v24 = vmax.f32 %v1355_v12, 0.0  ;;  %v1347_v25 = vadd.f32 %v1777_v57, %v1346_v41  ;;  %v1409_v43 = vpack.c.bf16 %v1394_v39, %v1393_v42 }
 0x6d9   :  { %v2218_v44 = vpop.f32.mrf.mxu1 }
 0x6da   :  { %v1358_v18 = vadd.f32 %v2218_v44, %v1777_v57  ;;  %v1397_v30 = vmax.f32 %v1347_v25, 0.0 }
 0x6db   :  { %v1349_v45 = vpop.f32.mrf.mxu1 }
 0x6dc   :  { %v1400_v8 = vmax.f32 %v1358_v18, 0.0  ;;  %v1350_v23 = vadd.f32 %v1777_v57, %v1349_v45 }
 0x6dd   :  { %v2221_v48 = vpop.f32.mrf.mxu1 }
 0x6de   :  { %v1371_v9 = vadd.f32 %v2221_v48, %v1777_v57  ;;  %v1412_v27 = vpack.c.bf16 %v1400_v8, %v1399_v24  ;;  %v1398_v28 = vmax.f32 %v1350_v23, 0.0  ;;  %v2367_v48 = vld [vmem:[#allocation10 + $0x8] sm:$0xff]  }
 0x6df   :  { %v1362_v49 = vpop.f32.mrf.mxu1 }
 0x6e0   :  { %v1403_v15 = vmax.f32 %v1371_v9, 0.0  ;;  %v1363_v17 = vadd.f32 %v1777_v57, %v1362_v49  ;;  %v1411_v35 = vpack.c.bf16 %v1398_v28, %v1397_v30  ;;  %v2368_v49 = vld [vmem:[#allocation10] sm:$0xff]  }
 0x6e1   :  { %v2222_v53 = vpop.f32.mrf.mxu1 }
 0x6e2   :  { %v1374_v4 = vadd.f32 %v2222_v53, %v1777_v57  ;;  %v1401_v22 = vmax.f32 %v1363_v17, 0.0  ;;  %v1113_v53 = vadd.f32 %v2706_v3, %v2718_v7 }
 0x6e3   :  { %v1365_v54 = vpop.f32.mrf.mxu1 }
 0x6e4   :  { %v1404_v11 = vmax.f32 %v1374_v4, 0.0  ;;  %v1366_v13 = vadd.f32 %v1777_v57, %v1365_v54 }
 0x6e5   :  { %v2225_v55 = vpop.f32.mrf.mxu1 }
 0x6e6   :  { %v1387_v60 = vadd.f32 %v2225_v55, %v1777_v57  ;;  %v1414_v19 = vpack.c.bf16 %v1404_v11, %v1403_v15  ;;  %v1402_v20 = vmax.f32 %v1366_v13, 0.0  ;;  %v1786_v55 = vld [vmem:[%s2775_s6] ss:$0 sm:$0xff]  ;;  %s2510_s6 = smov [#allocation11]  }
 0x6e7   :  { %v1378_v58 = vpop.f32.mrf.mxu1  ;;  %s1706_s20 = sshll.u32 %s2510_s6, 4  ;;  %s1707_s20 = int_to_ptr.vmem [resolvable:$true] %s1706_s20 }
 0x6e8   :  { %v1407_v21 = vmax.f32 %v1387_v60, 0.0  ;;  %v1379_v16 = vadd.f32 %v1777_v57, %v1378_v58  ;;  %v1413_v2 = vpack.c.bf16 %v1402_v20, %v1401_v22  ;;  %p2478_p12 = scmp.lt.s32.totalorder %s1707_s20, %s1707_s20 }
 0x6e9   :  { %v2226_v61 = vpop.f32.mrf.mxu1 }
 0x6ea   :  { %v1390_v62 = vadd.f32 %v2226_v61, %v1777_v57  ;;  %v1405_v10 = vmax.f32 %v1379_v16, 0.0  ;;  %v1685_v16 = vlaneseq }
 0x6eb   :  { %v1381_v63 = vpop.f32.mrf.mxu1 }
 0x6ec   :  { %v1408_v0 = vmax.f32 %v1390_v62, 0.0  ;;  %v1382_v1 = vadd.f32 %v1777_v57, %v1381_v63 }
 0x6ee   :  { %v1416_v5 = vpack.c.bf16 %v1408_v0, %v1407_v21  ;;  %v1406_v6 = vmax.f32 %v1382_v1, 0.0  ;;  %v1787_v0 = vld [vmem:[%s2777_s8] ss:$0 sm:$0xff]  ;;  %s2473_s8 = scalar_lea.vmem %s1707_s20, 128 }
 0x6ef   :  { %p2474_p11 = scmp.ne.s32.totalorder %s1707_s20, %s2473_s8  ;;  %p2479_p13 = scmp.lt.s32.totalorder %s2473_s8, %s2473_s8 }
 0x6f0   :  { %2228 = vmatpush3.bf16.msra.mxu0 %v1416_v5  ;;  %v1415_v14 = vpack.c.bf16 %v1406_v6, %v1405_v10 }
 0x6f1   :  { %2229 = vmatprep.subr.bf16.mxu0 %v2508_v56  ;;  %p2480_p0 = por %p2479_p13, %p2478_p12 }
 0x6f3   :  { %p2481_p1 = pnand %p2480_p0, %p2474_p11 }
 0x6f4   :  { %2230 = vmatpush3.bf16.msra.mxu0 %v1415_v14 }
 0x6f5   :  { %2231 = vmatprep.subr.bf16.mxu0 %v2508_v56 }
 0x6f8   :  { %2232 = vmatpush3.bf16.msra.mxu0 %v1414_v19 }
 0x6f9   :  { %2233 = vmatprep.subr.bf16.mxu0 %v2508_v56 }
 0x6fc   :  { %2234 = vmatpush3.bf16.msra.mxu0 %v1413_v2 }
 0x6fd   :  { %2235 = vmatprep.subr.bf16.mxu0 %v2508_v56 }
 0x700   :  { %2236 = vmatpush3.bf16.msra.mxu0 %v1412_v27 }
 0x701   :  { %2237 = vmatprep.subr.bf16.mxu0 %v2508_v56 }
 0x704   :  { %2238 = vmatpush3.bf16.msra.mxu0 %v1411_v35 }
 0x705   :  { %2239 = vmatprep.subr.bf16.mxu0 %v2508_v56 }
 0x708   :  { %2240 = vmatpush3.bf16.msra.mxu0 %v1410_v33 }
 0x709   :  { %2241 = vmatprep.subr.bf16.mxu0 %v2508_v56 }
 0x70c   :  { %2242 = vmatpush3.bf16.msra.mxu0 %v1409_v43 }
 0x70d   :  { %2267 = vmatprep.subr.bf16.mxu0 %v2508_v56 }
 0x70f   :  { %2244 = vmatmul.mubr.bf16.vlgmr.msra.gmra.mxu0 %v2634_v59  ;;  %v2365_v59 = vld [vmem:[#allocation10 + $0x18] sm:$0xff]  }
 0x710   :  { %2283 = vmatprep.mubr.msk.bf16.mxu0 %vm2509_vm0, %v2508_v56  ;;  %2268 = vmatpush3.bf16.msra.mxu0 %v2361_v47 }
 0x711   :  { %2269 = vmatprep.subr.bf16.mxu0 %v2508_v56 }
 0x714   :  { %2270 = vmatpush3.bf16.msra.mxu0 %v2362_v50 }
 0x715   :  { %2271 = vmatprep.subr.bf16.mxu0 %v2508_v56 }
 0x718   :  { %2272 = vmatpush3.bf16.msra.mxu0 %v2363_v51 }
 0x719   :  { %2273 = vmatprep.subr.bf16.mxu0 %v2508_v56 }
 0x71c   :  { %2274 = vmatpush3.bf16.msra.mxu0 %v2364_v52 }
 0x71d   :  { %2275 = vmatprep.subr.bf16.mxu0 %v2508_v56 }
 0x720   :  { %2276 = vmatpush3.bf16.msra.mxu0 %v2365_v59 }
 0x721   :  { %2277 = vmatprep.subr.bf16.mxu0 %v2508_v56 }
 0x724   :  { %2278 = vmatpush3.bf16.msra.mxu0 %v2366_v34 }
 0x725   :  { %2279 = vmatprep.subr.bf16.mxu0 %v2508_v56 }
 0x728   :  { %2280 = vmatpush3.bf16.msra.mxu0 %v2367_v48 }
 0x729   :  { %2281 = vmatprep.subr.bf16.mxu0 %v2508_v56  ;;  %v1686_v56 = vand.u32 127, %v1685_v16 }
 0x72b   :  { %vm1687_vm1 = vcmp.lt.s32.totalorder %v1686_v56, 4 }
 0x72c   :  { %2282 = vmatpush3.bf16.msra.mxu0 %v2368_v49 }
 0x7cf   :  { %v1451_v36 = vpop.f32.mrf.mxu0 }
 0x7d0   :  { %v1457_v40 = vpack.c.bf16 %v1451_v36, %v1451_v36 }
 0x7d1   :  { %v2245_v41 = vpop.f32.mrf.mxu0 }
 0x7d2   :  { %2264 = vmatmul.mubr.bf16.vlgmr.msra.gmra.mxu1 %v1457_v40 }
 0x7d3   :  { %v1454_v44 = vpop.f32.mrf.mxu0 }
 0x7d5   :  { %v2246_v45 = vpop.f32.mrf.mxu0 }
 0x892   :  { %v1557_v54 = vpop.f32.mrf.mxu1 }
 0x893   :  { %v1563_v57 = vadd.f32 %v1557_v54, %v1113_v53 }
 0x894   :  { %v2265_v58 = vpop.f32.mrf.mxu1 }
 0x895   :  { %v1571_v60 = vadd.f32 %v1786_v55, %v1563_v57 }
 0x896   :  { %v1560_v61 = vpop.f32.mrf.mxu1 }
 0x897   :  { %v1572_v62 = vmax.f32 %v1571_v60, 0.0 }
 0x898   :  { %v2266_v63 = vpop.f32.mrf.mxu1 }
 0x899   :  { %v1573_v21 = vpack.c.bf16 %v1572_v62, %v1572_v62 }
 0x89b   :  { %2284 = vmatmul.mubr.bf16.vlgmr.msra.gmra.mxu0 %v1573_v21 }
 0x95b   :  { %v1679_v3 = vpop.f32.mrf.mxu0 }
 0x95c   :  { %v1680_v7 = vadd.f32 %v1787_v0, %v1679_v3 }
 0x95d   :  { %v2285_v1 = vpop.f32.mrf.mxu0 }
 0x95e   :  { %v1688_v4 = vsel %vm1687_vm1, %v1680_v7, -1e+30 }
 0x95f   :  { %1689 = vmax.xlane.f32.xlu0 %v1688_v4  ;;  %v1682_v5 = vpop.f32.mrf.mxu0 }
 0x961   :  { %v2286_v6 = vpop.f32.mrf.mxu0 }
 0x9e8   :  { %v1690_v9 = vpop.xlane.xlu0 %1689 }
 0x9e9   :  { %v1691_v10 = vsub.f32 %v1688_v4, %v1690_v9 }
 0x9eb   :  { %v1692_v11 = vmul.f32 1.442695, %v1691_v10 }
 0x9ed   :  { %2369 = vpow2.f32 %v1692_v11 }
 0x9fa   :  { %v2370_v13 = vpop.eup %2369 }
 0x9fb   :  { %1694 = vadd.xlane.f32.xlu0 %v2370_v13 }
 0xa84   :  { %v1695_v14 = vpop.xlane.xlu0 %1694 }
 0xa85   :  { %2371 = vlog2.f32 %v1695_v14 }
 0xa92   :  { %v2372_v15 = vpop.eup %2371 }
 0xa93   :  { %v1697_v17 = vmul.f32 0.6931472, %v2372_v15 }
 0xa95   :  { %v1698_v18 = vsub.f32 %v1691_v10, %v1697_v17 }
 0xa97   :  { %1699 = vst [vmem:[#allocation11] sm:$0xff] %v1698_v18 }
 0xa98   :  { %2484 = shalt.err (!%p2481_p1)
}
 0xa99   :  { %1709 = dma.vmem_to_hbm [thread:$0]  %s1707_s20, 128, %s2778_s9, [#allocation4]  }
 0xa9a   :  { %2499 = dma.done.wait [#allocation4], 128  }
 0xa9b   :  { %2500 = vsyncadd [#allocation4], 4294967168 }
 0xa9c   :  { %1713 = vsyncpa [#allocation3], 1 }
 0xa9d   :  { %1714 = vsyncpa [#allocation6], 1 }
 0xa9e   :  { %1715 = vsyncpa [#allocation9], 1 }
 0xa9f   :  { %1716 = vsyncpa [#allocation4], 1 }

</bundles_post_ra>
